<compile_context>
chip_gen: v7x
topology: tpu7x:2x2x1
jax: 0.10.0
libtpu: 0.0.40
codegen_flags: <defaults>
</compile_context>

<pallas_src>
import functools

import jax
import jax.numpy as jnp
from jax.experimental import pallas as pl
from jax.experimental.pallas import tpu as pltpu


def _round_up(v, m):
    return ((v + m - 1) // m) * m


def _pad2d(x, rows, cols):
    r, c = x.shape
    return jnp.pad(x, ((0, rows - r), (0, cols - c)))


# ------------------------------------------------------------------ kernel bodies


def _sage_hidden_kernel(nnz_ref, kmap_ref, a_ref, xs_ref, xt_ref, invdeg_ref,
                        w_ref, b_ref, o_ref, acc_ref, *, agg_dim, tile_k,
                        xs_resident, num_k_tiles):
    """Fused hidden SAGEConv: mean-aggregate + [W_l; W_r] matmul + bias + ReLU.

    a_ref     : (TN, TK)          raw bf16 adjacency block (un-normalized edge weights)
    xs_ref    : (N, F) / (TK, F)  source features (VMEM-resident or streamed), bf16
    xt_ref    : (TN, F)           root/target features of this node tile, bf16
    invdeg_ref: (TN, 1)           f32 1/in-degree of this node tile
    w_ref     : (2F, F_out)       [W_l; W_r] stacked, bf16
    b_ref     : (1, F_out)        bias, f32
    acc_ref   : (TN, 2F)          f32 accumulator (left: aggregation, right: root stash)
    """
    del kmap_ref  # consumed by the index_maps only
    i = pl.program_id(0)
    k = pl.program_id(1)

    @pl.when(k == 0)
    def _init():
        acc_ref[:, :agg_dim] = jnp.zeros((acc_ref.shape[0], agg_dim), jnp.float32)
        # Stash root features so the epilogue is a single K = 2*f_in MXU matmul.
        acc_ref[:, agg_dim:] = xt_ref[...].astype(jnp.float32)

    # Skip all-zero adjacency blocks (their HBM fetch is also elided: the index_map
    # remaps a zero block to the previously fetched block index).
    @pl.when(nnz_ref[i * num_k_tiles + k] != 0)
    def _accumulate():
        if xs_resident:
            start = pl.multiple_of(k * tile_k, tile_k)
            xs = xs_ref[pl.ds(start, tile_k), :]
        else:
            xs = xs_ref[...]
        acc_ref[:, :agg_dim] += jnp.dot(a_ref[...], xs,
                                        preferred_element_type=jnp.float32)

    @pl.when(k == pl.num_programs(1) - 1)
    def _epilogue():
        # Mean normalization in f32 (A streamed raw weights -> no bf16(w/deg) loss).
        acc_ref[:, :agg_dim] = acc_ref[:, :agg_dim] * invdeg_ref[...]
        h = acc_ref[...].astype(w_ref.dtype)
        out = jnp.dot(h, w_ref[...], preferred_element_type=jnp.float32) + b_ref[...]
        o_ref[...] = jnp.maximum(out, 0.0).astype(o_ref.dtype)


def _sage_last_kernel(nnz_ref, kmap_ref, a_ref, ys_ref, root_ref, invdeg_ref,
                      o_ref, acc_ref, *, tile_k, xs_resident, num_k_tiles,
                      valid_out):
    """Fused last SAGEConv + log_softmax.

    ys_ref   : X @ W_l (precomputed, bf16), resident (N, F_out) or streamed (TK, F_out)
    root_ref : (TN, F_out) f32  precomputed X @ W_r + b for this node tile
    """
    del kmap_ref
    i = pl.program_id(0)
    k = pl.program_id(1)

    @pl.when(k == 0)
    def _init():
        acc_ref[...] = jnp.zeros_like(acc_ref)

    @pl.when(nnz_ref[i * num_k_tiles + k] != 0)
    def _accumulate():
        if xs_resident:
            start = pl.multiple_of(k * tile_k, tile_k)
            ys = ys_ref[pl.ds(start, tile_k), :]
        else:
            ys = ys_ref[...]
        acc_ref[...] += jnp.dot(a_ref[...], ys, preferred_element_type=jnp.float32)

    @pl.when(k == pl.num_programs(1) - 1)
    def _epilogue():
        out = acc_ref[...] * invdeg_ref[...] + root_ref[...]
        if valid_out < out.shape[-1]:
            col = jax.lax.broadcasted_iota(jnp.int32, out.shape, 1)
            out = jnp.where(col < valid_out, out, -1e30)   # mask lane padding
        m = jnp.max(out, axis=-1, keepdims=True)
        s = out - m
        o_ref[...] = (s - jnp.log(jnp.sum(jnp.exp(s), axis=-1, keepdims=True))
                      ).astype(o_ref.dtype)


# ------------------------------------------------------------------ pallas_call wrappers


def _sage_hidden_layer(a, x, invdeg, w_cat, b, nnz, kmap, *, tile_n, tile_k,
                       xs_resident, vmem_limit):
    n_pad, f_in_p = x.shape
    f_out_p = w_cat.shape[1]
    num_i, num_k = n_pad // tile_n, n_pad // tile_k

    a_map = lambda i, k, nnz_r, kmap_r: (i, kmap_r[i * num_k + k])
    if xs_resident:
        xs_spec = pl.BlockSpec((n_pad, f_in_p), lambda i, k, nnz_r, kmap_r: (0, 0))
    else:
        xs_spec = pl.BlockSpec((tile_k, f_in_p),
                               lambda i, k, nnz_r, kmap_r: (kmap_r[i * num_k + k], 0))

    kernel = functools.partial(_sage_hidden_kernel, agg_dim=f_in_p, tile_k=tile_k,
                               xs_resident=xs_resident, num_k_tiles=num_k)
    return pl.pallas_call(
        kernel,
        out_shape=jax.ShapeDtypeStruct((n_pad, f_out_p), jnp.bfloat16),
        grid_spec=pltpu.PrefetchScalarGridSpec(
            num_scalar_prefetch=2,
            grid=(num_i, num_k),
            in_specs=[
                pl.BlockSpec((tile_n, tile_k), a_map),                              # A block
                xs_spec,                                                            # source feats
                pl.BlockSpec((tile_n, f_in_p), lambda i, k, nnz_r, kmap_r: (i, 0)),  # root feats
                pl.BlockSpec((tile_n, 1), lambda i, k, nnz_r, kmap_r: (i, 0)),       # 1/deg
                pl.BlockSpec((2 * f_in_p, f_out_p),
                             lambda i, k, nnz_r, kmap_r: (0, 0)),                    # [W_l; W_r]
                pl.BlockSpec((1, f_out_p), lambda i, k, nnz_r, kmap_r: (0, 0)),      # bias
            ],
            out_specs=pl.BlockSpec((tile_n, f_out_p),
                                   lambda i, k, nnz_r, kmap_r: (i, 0)),
            scratch_shapes=[pltpu.VMEM((tile_n, 2 * f_in_p), jnp.float32)],
        ),
        compiler_params=pltpu.CompilerParams(
            dimension_semantics=("parallel", "arbitrary"),
            vmem_limit_bytes=vmem_limit),
    )(nnz, kmap, a, x, x, invdeg, w_cat, b)


def _sage_last_layer(a, ys, root, invdeg, nnz, kmap, *, tile_n, tile_k,
                     xs_resident, valid_out, vmem_limit):
    n_pad, f_out_p = ys.shape
    num_i, num_k = n_pad // tile_n, n_pad // tile_k

    a_map = lambda i, k, nnz_r, kmap_r: (i, kmap_r[i * num_k + k])
    if xs_resident:
        ys_spec = pl.BlockSpec((n_pad, f_out_p), lambda i, k, nnz_r, kmap_r: (0, 0))
    else:
        ys_spec = pl.BlockSpec((tile_k, f_out_p),
                               lambda i, k, nnz_r, kmap_r: (kmap_r[i * num_k + k], 0))

    kernel = functools.partial(_sage_last_kernel, tile_k=tile_k,
                               xs_resident=xs_resident, num_k_tiles=num_k,
                               valid_out=valid_out)
    return pl.pallas_call(
        kernel,
        out_shape=jax.ShapeDtypeStruct((n_pad, f_out_p), jnp.float32),
        grid_spec=pltpu.PrefetchScalarGridSpec(
            num_scalar_prefetch=2,
            grid=(num_i, num_k),
            in_specs=[
                pl.BlockSpec((tile_n, tile_k), a_map),                               # A block
                ys_spec,                                                             # X @ W_l
                pl.BlockSpec((tile_n, f_out_p), lambda i, k, nnz_r, kmap_r: (i, 0)),  # X@W_r + b
                pl.BlockSpec((tile_n, 1), lambda i, k, nnz_r, kmap_r: (i, 0)),        # 1/deg
            ],
            out_specs=pl.BlockSpec((tile_n, f_out_p),
                                   lambda i, k, nnz_r, kmap_r: (i, 0)),
            scratch_shapes=[pltpu.VMEM((tile_n, f_out_p), jnp.float32)],
        ),
        compiler_params=pltpu.CompilerParams(
            dimension_semantics=("parallel", "arbitrary"),
            vmem_limit_bytes=vmem_limit),
    )(nnz, kmap, a, ys, root, invdeg)


# ------------------------------------------------------------------ graph prep / tiling


def build_adjacency(edge_index, edge_weight, num_nodes):
    """Raw (weighted) dense adjacency + 1/in-degree for PyG-style mean aggregation.

    Edge (src=edge_index[0,e], dst=edge_index[1,e]) contributes w_e * x_src to dst;
    mean divides by the in-degree count.  Nodes with no incoming edges aggregate to 0.
    """
    src, dst = edge_index[0], edge_index[1]
    if edge_weight is None:
        edge_weight = jnp.ones(src.shape[0], dtype=jnp.float32)
    adj = jnp.zeros((num_nodes, num_nodes), jnp.float32).at[dst, src].add(edge_weight)
    deg = jnp.zeros((num_nodes,), jnp.float32).at[dst].add(1.0)
    inv_deg = 1.0 / jnp.maximum(deg, 1.0)
    return adj, inv_deg


def _block_tables(a_pad, tile_n, tile_k):
    """Flattened per-(node tile, source block) nonzero flags + DMA-skip remap table."""
    n_pad = a_pad.shape[0]
    num_i, num_k = n_pad // tile_n, n_pad // tile_k
    blocks = a_pad.reshape(num_i, tile_n, num_k, tile_k)
    nnz = jnp.any(blocks != 0.0, axis=(1, 3)).astype(jnp.int32)          # (num_i, num_k)
    # kmap[i,k] = k if block (i,k) is nonzero else the last nonzero k' < k, so the A/xs
    # index_maps repeat the previous block index and the HBM fetch is elided.
    idx = jnp.where(nnz > 0, jnp.arange(num_k, dtype=jnp.int32)[None, :], -1)
    kmap = jnp.maximum(jax.lax.cummax(idx, axis=1), 0).astype(jnp.int32)
    return nnz.reshape(-1), kmap.reshape(-1)


def _vmem_limit_bytes():
    """Per-generation scoped-VMEM cap: ~3/4 of physical (128 MiB v5e/v6e, 64 MiB v7x)."""
    cap = 64 * 1024 * 1024
    try:
        cap = int(getattr(pltpu.get_tpu_info(), "vmem_capacity_bytes", cap))
    except Exception:
        pass
    return min(cap * 3 // 4, 96 * 1024 * 1024)


def _layer_vmem_bytes(n_pad, tn, tk, resident, *, agg_w, row_w, row_bytes,
                      out_w, out_bytes, acc_w, w_rows):
    """Rough double-buffered VMEM footprint of one layer's pallas_call."""
    bufs = 2
    total = bufs * tn * tk * 2                                              # A blocks
    total += (bufs * n_pad * agg_w * 2) if resident else (bufs * tk * agg_w * 2)
    total += bufs * tn * row_w * row_bytes                                  # xt / root
    total += bufs * w_rows * out_w * 2                                      # stacked W
    total += bufs * tn * out_w * out_bytes                                  # output tiles
    total += bufs * (tn + 8) * 128 * 4                                      # inv_deg + bias
    total += tn * acc_w * 4                                                 # accumulator
    return total


def _choose_tiles(n_pad, vmem_limit, budget_fn, want_tn=512, want_tk=1024):
    """Largest (tile_n, tile_k, resident-xs) fitting ~70% of the VMEM limit.

    Tiles are multiples of 128 dividing n_pad; keeps >=2 node tiles when possible so the
    'parallel' grid axis can split across v7x's two TensorCores.
    """
    def divisors(maxv):
        return [t for t in range(min(maxv, n_pad), 0, -128) if n_pad % t == 0]

    budget = int(vmem_limit * 0.7)
    for resident in (True, False):
        for tn in divisors(want_tn):
            if n_pad > 128 and n_pad // tn < 2:
                continue
            for tk in divisors(want_tk):
                if budget_fn(tn, tk, resident) <= budget:
                    return tn, tk, resident
    return 128, 128, False


# ------------------------------------------------------------------ model


def _reference_forward(x, a_raw, inv_deg, params):
    """Pure-JAX f32 reference of the eval-mode SAGE forward."""
    h = x
    n_layers = len(params)
    for li, (w_l, w_r, b) in enumerate(params):
        agg = (a_raw @ h) * inv_deg[:, None]
        out = agg @ w_l + h @ w_r + b
        if li < n_layers - 1:
            h = jnp.maximum(out, 0.0)
        else:
            out = out - jnp.max(out, axis=-1, keepdims=True)
            h = out - jnp.log(jnp.sum(jnp.exp(out), axis=-1, keepdims=True))
    return h


class SAGEPallas:
    """Parameter container + eval-mode forward for the SAGE module."""

    def __init__(self, in_channels, hidden_channels, out_channels, num_layers,
                 dropout, key):
        self.dropout = dropout  # TODO(synk): training-mode dropout not applied (eval-mode forward).
        self.out_channels = out_channels
        dims = [in_channels] + [hidden_channels] * (num_layers - 1) + [out_channels]
        self.params = []
        for li in range(num_layers):
            f_in, f_out = dims[li], dims[li + 1]
            key, k1, k2 = jax.random.split(key, 3)
            scale = 1.0 / jnp.sqrt(jnp.float32(f_in))
            w_l = jax.random.normal(k1, (f_in, f_out), jnp.float32) * scale
            w_r = jax.random.normal(k2, (f_in, f_out), jnp.float32) * scale
            b_l = jnp.zeros((1, f_out), jnp.float32)
            self.params.append((w_l, w_r, b_l))

    def __call__(self, x, edge_index, edge_weight=None, *, tile_n=None,
                 tile_k=None, xs_resident=None):
        n, f0 = x.shape
        num_layers = len(self.params)
        vmem_limit = _vmem_limit_bytes()

        # TODO(synk): dense N x N adjacency is demo-scale only; OGB-products needs sparse
        # CSR neighbor blocks via scalar-prefetch + gather DMA instead of dense blocks.
        a_raw, inv_deg = build_adjacency(edge_index, edge_weight, n)

        # Pad the node axis to a multiple of 128 only; tiles are chosen as divisors.
        n_pad = _round_up(n, 128)
        a_pad = _pad2d(a_raw, n_pad, n_pad)
        a_bf = a_pad.astype(jnp.bfloat16)
        invdeg_p = jnp.pad(inv_deg, (0, n_pad - n), constant_values=1.0)[:, None]

        f0_p = _round_up(f0, 128)
        h = _pad2d(x, n_pad, f0_p).astype(jnp.bfloat16)

        for li, (w_l, w_r, b_l) in enumerate(self.params):
            last = li == num_layers - 1
            f_in, f_out = w_l.shape
            f_in_p, f_out_p = _round_up(f_in, 128), _round_up(f_out, 128)

            if last:
                budget_kwargs = dict(agg_w=f_out_p, row_w=f_out_p, row_bytes=4,
                                     out_w=f_out_p, out_bytes=4, acc_w=f_out_p,
                                     w_rows=0)
            else:
                budget_kwargs = dict(agg_w=f_in_p, row_w=f_in_p, row_bytes=2,
                                     out_w=f_out_p, out_bytes=2, acc_w=2 * f_in_p,
                                     w_rows=2 * f_in_p)
            auto_tn, auto_tk, auto_res = _choose_tiles(
                n_pad, vmem_limit,
                lambda tn_, tk_, res_: _layer_vmem_bytes(n_pad, tn_, tk_, res_,
                                                         **budget_kwargs))
            tn = tile_n if tile_n is not None else auto_tn
            tk = tile_k if tile_k is not None else auto_tk
            res = xs_resident if xs_resident is not None else auto_res
            assert n_pad % tn == 0 and n_pad % tk == 0, "tiles must divide padded N"

            nnz, kmap = _block_tables(a_pad, tn, tk)
            b_p = _pad2d(b_l, 1, f_out_p)

            if last:
                w_l_bf = _pad2d(w_l, f_in_p, f_out_p).astype(jnp.bfloat16)
                w_r_bf = _pad2d(w_r, f_in_p, f_out_p).astype(jnp.bfloat16)
                # Reassociate to inv_deg * (A @ (X @ W_l)) + (X @ W_r + b): both thin
                # projections are precomputed outside the kernel.
                ys = jnp.dot(h, w_l_bf,
                             preferred_element_type=jnp.float32).astype(jnp.bfloat16)
                root = jnp.dot(h, w_r_bf, preferred_element_type=jnp.float32) + b_p
                h = _sage_last_layer(a_bf, ys, root, invdeg_p, nnz, kmap,
                                     tile_n=tn, tile_k=tk, xs_resident=res,
                                     valid_out=f_out, vmem_limit=vmem_limit)
            else:
                w_cat = jnp.concatenate(
                    [_pad2d(w_l, f_in_p, f_out_p), _pad2d(w_r, f_in_p, f_out_p)],
                    axis=0).astype(jnp.bfloat16)
                h = _sage_hidden_layer(a_bf, h, invdeg_p, w_cat, b_p, nnz, kmap,
                                       tile_n=tn, tile_k=tk, xs_resident=res,
                                       vmem_limit=vmem_limit)

        return h[:n, :self.out_channels]


if __name__ == "__main__":
    key = jax.random.PRNGKey(0)
    k_feat, k_src1, k_src2, k_dst, k_param = jax.random.split(key, 5)

    num_nodes = 512
    in_channels = 100
    hidden_channels = 256
    out_channels = 47
    num_layers = 3
    num_edges = 4096

    x = jax.random.normal(k_feat, (num_nodes, in_channels), jnp.float32)
    # Sources avoid [192, 384) so some 128-wide adjacency column blocks are all-zero,
    # exercising the zero-block skip path in the small-tile config below.
    src = jnp.concatenate([
        jax.random.randint(k_src1, (num_edges // 2,), 0, 192, jnp.int32),
        jax.random.randint(k_src2, (num_edges // 2,), 384, num_nodes, jnp.int32)])
    dst = jax.random.randint(k_dst, (num_edges,), 0, num_nodes, jnp.int32)
    edge_index = jnp.stack([src, dst], axis=0)

    model = SAGEPallas(in_channels, hidden_channels, out_channels, num_layers,
                       dropout=0.5, key=k_param)

    a_raw, inv_deg = build_adjacency(edge_index, None, num_nodes)
    ref = _reference_forward(x, a_raw, inv_deg, model.params)

    # Config 1: auto-chosen large tiles with VMEM-resident source features.
    out_auto = jax.block_until_ready(model(x, edge_index))
    # Config 2: forced small tiles + streamed source features -> exercises the multi-step
    # reduction, zero-block skipping (compute + DMA elision) and the streamed-xs path.
    out_small = jax.block_until_ready(
        model(x, edge_index, tile_n=128, tile_k=128, xs_resident=False))

    for out in (out_auto, out_small):
        assert out.shape == (num_nodes, out_channels)
        row_sums = jnp.sum(jnp.exp(out), axis=-1)      # log_softmax rows exp-sum to 1
        assert bool(jnp.all(jnp.abs(row_sums - 1.0) < 1e-3))
        max_err = float(jnp.max(jnp.abs(out - ref)))   # bf16 streams -> loose tolerance
        assert max_err < 0.3, f"max abs error vs reference: {max_err}"

    print("KERNEL_OK")
</pallas_src>

<mosaic_0001>
module attributes {stable_mosaic.version = 11 : i64} {
  func.func @_sage_hidden_kernel(%arg0: i32, %arg1: i32, %arg2: memref<2xi32, #tpu.memory_space<smem>>, %arg3: memref<2xi32, #tpu.memory_space<smem>>, %arg4: memref<256x512xbf16, #tpu.memory_space<vmem>>, %arg5: memref<512x128xbf16, #tpu.memory_space<vmem>>, %arg6: memref<256x128xbf16, #tpu.memory_space<vmem>>, %arg7: memref<256x1xf32, #tpu.memory_space<vmem>>, %arg8: memref<256x256xbf16, #tpu.memory_space<vmem>>, %arg9: memref<1x256xf32, #tpu.memory_space<vmem>>, %arg10: memref<256x256xbf16, #tpu.memory_space<vmem>>, %arg11: memref<256x256xf32, #tpu.memory_space<vmem>>) attributes {dimension_semantics = [#tpu.dimension_semantics<parallel>, #tpu.dimension_semantics<arbitrary>], iteration_bounds = array<i64: 2, 1>, scalar_prefetch = 2 : i64, scratch_operands = 1 : i64, tpu.core_type = #tpu.core_type<tc>, window_params = [{transform_indices = @transform_0, window_bounds = array<i64: 256, 512>}, {pipeline_mode = #tpu.pipeline_mode<synchronous>, transform_indices = @transform_1, window_bounds = array<i64: 512, 128>}, {transform_indices = @transform_2, window_bounds = array<i64: 256, 128>}, {transform_indices = @transform_3, window_bounds = array<i64: 256, 1>}, {pipeline_mode = #tpu.pipeline_mode<synchronous>, transform_indices = @transform_4, window_bounds = array<i64: 256, 256>}, {pipeline_mode = #tpu.pipeline_mode<synchronous>, transform_indices = @transform_5, window_bounds = array<i64: 1, 256>}, {transform_indices = @transform_6, window_bounds = array<i64: 256, 256>}]} {
    %c0_i32 = arith.constant 0 : i32
    %0 = arith.cmpi eq, %arg1, %c0_i32 : i32
    %1 = arith.extui %0 : i1 to i32
    %c0_i32_0 = arith.constant 0 : i32
    %2 = arith.cmpi ne, %1, %c0_i32_0 : i32
    scf.if %2 {
      %cst = arith.constant 0.000000e+00 : f32
      %13 = vector.broadcast %cst : f32 to vector<256x128xf32>
      %c0 = arith.constant 0 : index
      %c0_5 = arith.constant 0 : index
      %14 = vector.load %arg11[%c0, %c0_5] : memref<256x256xf32, #tpu.memory_space<vmem>>, vector<256x128xf32>
      tpu.vector_store %arg11[%c0, %c0_5], %13 {strides = array<i32>} : memref<256x256xf32, #tpu.memory_space<vmem>>, vector<256x128xf32>,
      %c0_6 = arith.constant 0 : index
      %c0_7 = arith.constant 0 : index
      %15 = vector.load %arg6[%c0_6, %c0_7] : memref<256x128xbf16, #tpu.memory_space<vmem>>, vector<256x128xbf16>
      %16 = arith.extf %15 : vector<256x128xbf16> to vector<256x128xf32>
      %c0_8 = arith.constant 0 : index
      %c128 = arith.constant 128 : index
      %17 = vector.load %arg11[%c0_8, %c128] : memref<256x256xf32, #tpu.memory_space<vmem>>, vector<256x128xf32>
      tpu.vector_store %arg11[%c0_8, %c128], %16 {strides = array<i32>} : memref<256x256xf32, #tpu.memory_space<vmem>>, vector<256x128xf32>,
    } else {
    }
    %c1_i32 = arith.constant 1 : i32
    %3 = arith.muli %arg0, %c1_i32 : i32
    %4 = arith.addi %3, %arg1 : i32
    %5 = arith.index_cast %4 : i32 to index
    %6 = memref.load %arg2[%5] : memref<2xi32, #tpu.memory_space<smem>>
    %c0_i32_1 = arith.constant 0 : i32
    %7 = arith.cmpi ne, %6, %c0_i32_1 : i32
    %8 = arith.extui %7 : i1 to i32
    %c0_i32_2 = arith.constant 0 : i32
    %9 = arith.cmpi ne, %8, %c0_i32_2 : i32
    scf.if %9 {
      %c512_i32 = arith.constant 512 : i32
      %13 = arith.muli %arg1, %c512_i32 : i32
      %14 = tpu.assume_multiple %13, 512 : i32
      %15 = arith.index_cast %14 : i32 to index
      %c0 = arith.constant 0 : index
      %16 = vector.load %arg5[%15, %c0] : memref<512x128xbf16, #tpu.memory_space<vmem>>, vector<512x128xbf16>
      %c0_5 = arith.constant 0 : index
      %c0_6 = arith.constant 0 : index
      %17 = vector.load %arg11[%c0_5, %c0_6] : memref<256x256xf32, #tpu.memory_space<vmem>>, vector<256x128xf32>
      %c0_7 = arith.constant 0 : index
      %c0_8 = arith.constant 0 : index
      %18 = vector.load %arg4[%c0_7, %c0_8] : memref<256x512xbf16, #tpu.memory_space<vmem>>, vector<256x512xbf16>
      %cst = arith.constant dense<0.000000e+00> : vector<256x128xf32>
      %19 = tpu.matmul %18, %16, %cst {dimension_numbers = #tpu.dot_dimension_numbers<[1], [0], [0], [1], [0, 0, 1, 1], [], []>} : vector<256x512xbf16>, vector<512x128xbf16>, vector<256x128xf32> -> vector<256x128xf32>
      %20 = arith.addf %17, %19 : vector<256x128xf32>
      %c0_9 = arith.constant 0 : index
      %c0_10 = arith.constant 0 : index
      %21 = vector.load %arg11[%c0_9, %c0_10] : memref<256x256xf32, #tpu.memory_space<vmem>>, vector<256x128xf32>
      tpu.vector_store %arg11[%c0_9, %c0_10], %20 {strides = array<i32>} : memref<256x256xf32, #tpu.memory_space<vmem>>, vector<256x128xf32>,
    } else {
    }
    %c0_i32_3 = arith.constant 0 : i32
    %10 = arith.cmpi eq, %arg1, %c0_i32_3 : i32
    %11 = arith.extui %10 : i1 to i32
    %c0_i32_4 = arith.constant 0 : i32
    %12 = arith.cmpi ne, %11, %c0_i32_4 : i32
    scf.if %12 {
      %c0 = arith.constant 0 : index
      %c0_5 = arith.constant 0 : index
      %13 = vector.load %arg11[%c0, %c0_5] : memref<256x256xf32, #tpu.memory_space<vmem>>, vector<256x128xf32>
      %c0_6 = arith.constant 0 : index
      %c0_7 = arith.constant 0 : index
      %14 = vector.load %arg7[%c0_6, %c0_7] : memref<256x1xf32, #tpu.memory_space<vmem>>, vector<256x1xf32>
      %15 = vector.broadcast %14 : vector<256x1xf32> to vector<256x128xf32>
      %16 = arith.mulf %13, %15 : vector<256x128xf32>
      %c0_8 = arith.constant 0 : index
      %c0_9 = arith.constant 0 : index
      %17 = vector.load %arg11[%c0_8, %c0_9] : memref<256x256xf32, #tpu.memory_space<vmem>>, vector<256x128xf32>
      tpu.vector_store %arg11[%c0_8, %c0_9], %16 {strides = array<i32>} : memref<256x256xf32, #tpu.memory_space<vmem>>, vector<256x128xf32>,
      %c0_10 = arith.constant 0 : index
      %c0_11 = arith.constant 0 : index
      %18 = vector.load %arg11[%c0_10, %c0_11] : memref<256x256xf32, #tpu.memory_space<vmem>>, vector<256x256xf32>
      %19 = arith.truncf %18 : vector<256x256xf32> to vector<256x256xbf16>
      %c0_12 = arith.constant 0 : index
      %c0_13 = arith.constant 0 : index
      %20 = vector.load %arg8[%c0_12, %c0_13] : memref<256x256xbf16, #tpu.memory_space<vmem>>, vector<256x256xbf16>
      %cst = arith.constant dense<0.000000e+00> : vector<256x256xf32>
      %21 = tpu.matmul %19, %20, %cst {dimension_numbers = #tpu.dot_dimension_numbers<[1], [0], [0], [1], [0, 0, 1, 1], [], []>} : vector<256x256xbf16>, vector<256x256xbf16>, vector<256x256xf32> -> vector<256x256xf32>
      %c0_14 = arith.constant 0 : index
      %c0_15 = arith.constant 0 : index
      %22 = vector.load %arg9[%c0_14, %c0_15] : memref<1x256xf32, #tpu.memory_space<vmem>>, vector<1x256xf32>
      %23 = vector.broadcast %22 : vector<1x256xf32> to vector<256x256xf32>
      %24 = arith.addf %21, %23 : vector<256x256xf32>
      %cst_16 = arith.constant 0.000000e+00 : f32
      %25 = vector.broadcast %cst_16 : f32 to vector<256x256xf32>
      %26 = arith.maximumf %24, %25 : vector<256x256xf32>
      %27 = arith.truncf %26 : vector<256x256xf32> to vector<256x256xbf16>
      %c0_17 = arith.constant 0 : index
      %c0_18 = arith.constant 0 : index
      %28 = vector.load %arg10[%c0_17, %c0_18] : memref<256x256xbf16, #tpu.memory_space<vmem>>, vector<256x256xbf16>
      tpu.vector_store %arg10[%c0_17, %c0_18], %27 {strides = array<i32>} : memref<256x256xbf16, #tpu.memory_space<vmem>>, vector<256x256xbf16>,
    } else {
    }
    return
  }
  func.func @transform_0(%arg0: i32, %arg1: i32, %arg2: memref<2xi32, #tpu.memory_space<smem>>, %arg3: memref<2xi32, #tpu.memory_space<smem>>) -> (i32, i32) {
    %c1_i32 = arith.constant 1 : i32
    %0 = arith.muli %arg0, %c1_i32 : i32
    %1 = arith.addi %0, %arg1 : i32
    %2 = arith.index_cast %1 : i32 to index
    %3 = memref.load %arg3[%2] : memref<2xi32, #tpu.memory_space<smem>>
    %c0_i32 = arith.constant 0 : i32
    return %arg0, %3 : i32, i32
  }
  func.func @transform_1(%arg0: i32, %arg1: i32, %arg2: memref<2xi32, #tpu.memory_space<smem>>, %arg3: memref<2xi32, #tpu.memory_space<smem>>) -> (i32, i32) {
    %c0_i32 = arith.constant 0 : i32
    %c0_i32_0 = arith.constant 0 : i32
    %c0_i32_1 = arith.constant 0 : i32
    return %c0_i32, %c0_i32_0 : i32, i32
  }
  func.func @transform_2(%arg0: i32, %arg1: i32, %arg2: memref<2xi32, #tpu.memory_space<smem>>, %arg3: memref<2xi32, #tpu.memory_space<smem>>) -> (i32, i32) {
    %c0_i32 = arith.constant 0 : i32
    %c0_i32_0 = arith.constant 0 : i32
    return %arg0, %c0_i32 : i32, i32
  }
  func.func @transform_3(%arg0: i32, %arg1: i32, %arg2: memref<2xi32, #tpu.memory_space<smem>>, %arg3: memref<2xi32, #tpu.memory_space<smem>>) -> (i32, i32) {
    %c0_i32 = arith.constant 0 : i32
    %c0_i32_0 = arith.constant 0 : i32
    return %arg0, %c0_i32 : i32, i32
  }
  func.func @transform_4(%arg0: i32, %arg1: i32, %arg2: memref<2xi32, #tpu.memory_space<smem>>, %arg3: memref<2xi32, #tpu.memory_space<smem>>) -> (i32, i32) {
    %c0_i32 = arith.constant 0 : i32
    %c0_i32_0 = arith.constant 0 : i32
    %c0_i32_1 = arith.constant 0 : i32
    return %c0_i32, %c0_i32_0 : i32, i32
  }
  func.func @transform_5(%arg0: i32, %arg1: i32, %arg2: memref<2xi32, #tpu.memory_space<smem>>, %arg3: memref<2xi32, #tpu.memory_space<smem>>) -> (i32, i32) {
    %c0_i32 = arith.constant 0 : i32
    %c0_i32_0 = arith.constant 0 : i32
    %c0_i32_1 = arith.constant 0 : i32
    return %c0_i32, %c0_i32_0 : i32, i32
  }
  func.func @transform_6(%arg0: i32, %arg1: i32, %arg2: memref<2xi32, #tpu.memory_space<smem>>, %arg3: memref<2xi32, #tpu.memory_space<smem>>) -> (i32, i32) {
    %c0_i32 = arith.constant 0 : i32
    %c0_i32_0 = arith.constant 0 : i32
    return %arg0, %c0_i32 : i32, i32
  }
}

</mosaic_0001>

<bundles_post_ra>
// kernel: tpu_custom_call.1
= control target key start
LH: loop header
LB: loop body
LE: loop exit
PB: predicated region body
PF: predicated region fallthrough
CT: control target
= control target key end

     0   :  { %s4470_s0 = inlined_call_operand.vmem [shape: s32[2], index: 0, kind: input, shape index: {}]   ;;  %s4471_s2 = inlined_call_operand.hbm [shape: bf16[512,512], index: 2, kind: input, shape index: {}]   ;;  %s4472_s3 = inlined_call_operand.vmem [shape: bf16[512,128], index: 3, kind: input, shape index: {}]   ;;  %s4473_s4 = inlined_call_operand.vmem [shape: bf16[512,128], index: 4, kind: input, shape index: {}]   ;;  %s4474_s5 = inlined_call_operand.vmem [shape: f32[512,1], index: 5, kind: input, shape index: {}]   ;;  %s4475_s6 = inlined_call_operand.hbm [shape: bf16[256,256], index: 6, kind: input, shape index: {}]   ;;  %s4476_s7 = inlined_call_operand.vmem [shape: f32[1,256], index: 7, kind: input, shape index: {}]   ;;  %s4477_s8 = inlined_call_operand.hbm [shape: bf16[512,256], index: 8, kind: output, shape index: {}]   ;;  %s4478_s1 = inlined_call_operand.vmem [shape: s32[2], index: 1, kind: input, shape index: {}]  }
   0x1   :  { %4491 = sst [smem:[#allocation24_spill]] %s4475_s6  ;;  %s13_s29 = sshll.u32 %s4470_s0, 4  ;;  %s14_s29 = int_to_ptr.vmem [resolvable:$true] %s13_s29 }
   0x2   :  { %4492 = sst [smem:[#allocation25_spill]] %s4477_s8  ;;  %s17_s10 = sshll.u32 %s4478_s1, 4  ;;  %s18_s10 = int_to_ptr.vmem [resolvable:$true] %s17_s10 }
   0x3   :  { %s3622_s11 = scalar_lea.vmem %s14_s29, 16  ;;  %p3627_p1 = scmp.lt.s32.totalorder %s14_s29, %s14_s29 }
   0x4   :  { %p3623_p0 = scmp.ne.s32.totalorder %s14_s29, %s3622_s11  ;;  %p3628_p2 = scmp.lt.s32.totalorder %s3622_s11, %s3622_s11 }
   0x6   :  { %p3629_p3 = por %p3628_p2, %p3627_p1 }
   0x8   :  { %p3630_p4 = pnand %p3629_p3, %p3623_p0 }
   0xa   :  { %3633 = shalt.err (!%p3630_p4)  }
   0xb   :  { %s3818_s12 = smov [#allocation4]   ;;  %s3634_s13 = scalar_lea.vmem %s18_s10, 16 }
   0xc   :  { %16 = dma.vmem_to_smem %s14_s29, 16, %s3818_s12, [#allocation3] }
   0xd   :  { %p3635_p5 = scmp.ne.s32.totalorder %s18_s10, %s3634_s13  ;;  %p3639_p6 = scmp.lt.s32.totalorder %s18_s10, %s18_s10 }
   0xe   :  { %p3640_p7 = scmp.lt.s32.totalorder %s3634_s13, %s3634_s13 }
  0x10   :  { %p3641_p8 = por %p3640_p7, %p3639_p6 }
  0x12   :  { %p3642_p9 = pnand %p3641_p8, %p3635_p5 }
  0x14   :  { %3645 = shalt.err (!%p3642_p9)  }
  0x15   :  { %s3819_s0 = smov [#allocation5]  }
  0x16   :  { %20 = dma.vmem_to_smem %s18_s10, 16, %s3819_s0, [#allocation3] }
  0x17   :  { %3768 = dma.done.wait [#allocation3], 32 }
  0x18   :  { %3769 = vsyncadd [#allocation3], 4294967264 }
  0x19   :  { %22 = sfence }
  0x1a   :  { %23 = vsyncpa [#allocation7], 0 }
  0x1b   :  { %25 = vsyncpa [#allocation7 + $0x1], 0 }
  0x1c   :  { %26 = vsyncpa [#allocation10], 0 }
  0x1d   :  { %27 = vsyncpa [#allocation8], 0 }
  0x1e   :  { %29 = vsyncpa [#allocation8 + $0x1], 0  ;;  %s3882_s1 = smov 0   ;;  %s3884_s14 = smov 0  }
  0x1f   :  { %s3886_s15 = smov 0   ;;  %s3888_s16 = smov 0  }
  0x20   :  { %s3890_s17 = smov 0   ;;  %s3892_s18 = smov 0  }
  0x21   :  { %s3894_s19 = smov 0   ;;  %s3896_s20 = smov 0  }
  0x22   :  { %s3898_s21 = smov 0  }
  0x23 LB: > { %4493 = sst [smem:[#allocation18_spill]] %s3784_s1  ;;  %s2778_s22 = sadd.s32 4294967295, %s3816_s21   ;;  %s3816_s21 = sphi %s3898_s21, %s35_s21   ;;  %s3812_s20 = sphi %s3896_s20, %s4528_s20   ;;  %s3808_s19 = sphi %s3894_s19, %s4527_s19   ;;  %s3804_s18 = sphi %s3892_s18, %s4526_s18   ;;  %s3800_s17 = sphi %s3890_s17, %s4525_s17   ;;  %s3796_s16 = sphi %s3888_s16, %s4524_s16   ;;  %s3792_s15 = sphi %s3886_s15, %s4519_s15   ;;  %s3788_s14 = sphi %s3884_s14, %s4523_s14   ;;  %s3784_s1 = sphi %s3882_s1, %s4522_s1  }
  0x24   : > { %4494 = sst [smem:[#allocation19_spill]] %s3792_s15  ;;  %s2779_s23 = sadd.s32 4294967294, %s3816_s21  }
  0x25   : > { %4495 = sst [smem:[#allocation20_spill]] %s3816_s21  ;;  %p73_p10 = scmp.ne.s32.totalorder %s3800_s17, %s3796_s16 }
  0x26   : > { %p3928_p11 = scmp.eq.s32.totalorder %s2778_s22, 0  ;;  %p211_p12 = scmp.ne.s32.totalorder %s3792_s15, %s3788_s14 }
  0x27   : > { %p212_p0 = scmp.eq.s32.totalorder %s2778_s22, 1  ;;  %p217_p1 = scmp.ne.s32.totalorder %s3788_s14, %s3784_s1 }
  0x28   : > { %s4496_s24 = scalar_select %p3928_p11, 1, 0 }
  0x29   : > { %p3936_p13 = por %p3928_p11, %p73_p10  ;;  %p218_p2 = scmp.eq.s32.totalorder %s2779_s23, 1 }
  0x2a   : > { %p3942_p3 = por %p212_p0, %p211_p12  ;;  %p2780_p4 = scmp.ge.s32.totalorder %s3816_s21, 1 }
  0x2b   : > { %s4497_s25 = scalar_select %p3936_p13, 1, 0 }
  0x2c   : > { %s4498_s26 = scalar_select %p3942_p3, 1, 0 }
  0x2d   : > { %p3947_p5 = por %p218_p2, %p217_p1  ;;  %p225_p6 = scmp.lt.s32.totalorder %s3816_s21, 3 }
  0x2e   : > { %s3820_s29 = smov [#allocation9]   ;;  %s47_s10 = sadd.s32 1, %s3812_s20 }
  0x2f   : > { %s4499_s27 = scalar_select %p3947_p5, 1, 0 }
  0x30   : > { %p3952_p7 = pnand %p2780_p4, %p225_p6  ;;  %s240_s30 = sshll.u32 %s3820_s29, 4  ;;  %s241_s30 = int_to_ptr.vmem [resolvable:$true] %s240_s30 }
  0x31   : > { %4500 = sst [smem:[#allocation21_spill]] %s4499_s27  ;;  %s4503_s6 = sld [smem:[#allocation24_spill]] }
  0x32   : > { %s4501_s28 = scalar_select %p3952_p7, 1, 0 }
  0x33   : > { %p3343_p8 = pneg %p3952_p7 }
  0x35   : > { %p3961_p10 = pnand %p3343_p8, %p3928_p11 }
  0x37   : > { %s3646_s13 = scalar_lea.hbm %s4503_s6, 4096  ;;  %p3648_p0 = pneg %p3961_p10 }
  0x38   : > { %p3647_p12 = scmp.ne.s32.totalorder %s4503_s6, %s3646_s13  ;;  %p3653_p4 = scmp.lt.u32.totalorder %s3646_s13, %s4503_s6 }
  0x3a   : > { %p3649_p1 = pnand %p3648_p0, %p3647_p12 }
  0x3c   : > { %p3650_p2 = pneg %p3649_p1 }
  0x3e   : > { %p3655_p6 = pnand %p3653_p4, %p3650_p2 }
  0x40   : > { %3658 = shalt.err (!%p3655_p6)
}
  0x41   : > { %s3659_s29 = scalar_lea.vmem %s241_s30, 4096  ;;  %p3667_p3 = scmp.lt.s32.totalorder %s241_s30, %s241_s30 }
  0x42   : > { %p3660_p8 = scmp.ne.s32.totalorder %s241_s30, %s3659_s29  ;;  %p3668_p11 = scmp.lt.s32.totalorder %s3659_s29, %s3659_s29 }
  0x44   : > { %p3662_p9 = pnand %p3660_p8, %p3648_p0  ;;  %p3669_p13 = por %p3668_p11, %p3667_p3 }
  0x46   : > { %p3663_p5 = pneg %p3662_p9 }
  0x48   : > { %p3670_p7 = pnand %p3669_p13, %p3663_p5 }
  0x4a   : > { %3673 = shalt.err (!%p3670_p7)
}
  0x4b   : > { %s3821_s11 = smov 128   ;;  %s3822_s12 = smov 8  }
  0x4c   : > { %3346 = dma.hbm_to_vmem [thread:$0]  (!%p3961_p10), %s4503_s6, 4096, %s241_s30, [#allocation10], %s3821_s11, %s3821_s11, %s3822_s12  }
  0x4d   : > { %p49_p11 = scmp.ge.s32.totalorder %s47_s10, 2  ;;  %s52_s16 = sld [smem:[#allocation5 + %s3812_s20]] }
  0x4e   : > { %p67_p13 = scmp.ne.s32.totalorder %s3804_s18, %s3800_s17  ;;  %s201_s22 = sadd.s32 1, %s3792_s15 }
  0x4f   : > { %s4530_s10 = smov (%p49_p11, %s47_s10), 0  ;;  %p68_p3 = scmp.eq.s32.totalorder %s3816_s21, 0 }
  0x50   : > { %4504 = sst [smem:[#allocation22_spill]] %s4530_s10  ;;  %s55_s29 = ssub.s32 %s3812_s20, %s4530_s10 }
  0x51   : > { %s54_s23 = sld [smem:[#allocation5 + %s4530_s10]]  ;;  %p199_p5 = scmp.eq.s32.totalorder %s55_s29, 0 }
  0x52   : > { %p3992_p7 = por %p68_p3, %p67_p13  ;;  %p3358_p9 = scmp.lt.s32.totalorder %s3816_s21, 2 }
  0x53   : > { %s3998_s30 = scalar_select %p199_p5, %s3792_s15, %s201_s22  }
  0x54   : > { %s257_s11 = sand.u32 1, %s3804_s18   ;;  %p4003_p10 = pnand %p3358_p9, %p3992_p7 }
  0x55   : > { %4506 = sst [smem:[#allocation23_spill]] %s3998_s30  ;;  %s60_s0 = sadd.s32 1, %s3804_s18 }
  0x56   : > { %s2783_s10 = sshll.u32 %s257_s11, 9  ;;  %s2963_s8 = sshll.u32 %s3812_s20, 7 }
  0x57   : > { %s56_s13 = ssub.s32 %s52_s16, %s54_s23  ;;  %s261_s15 = scalar_lea.vmem [#allocation6], %s2783_s10 }
  0x58   : > { %s57_s6 = sor.u32 %s56_s13, %s55_s29  ;;  %s273_s21 = sshll.u32 %s261_s15, 4  ;;  %s4017_s21 = int_to_ptr.vmem [resolvable:$true] %s273_s21 }
  0x59   : > { %p58_p12 = scmp.eq.s32.totalorder %s57_s6, 0  ;;  %s4024_s9 = scalar_lea.sflag [#allocation7], %s257_s11 }
  0x5a   : > { %s3335_s27 = scalar_select %p3992_p7, [#allocation5], [#allocation12] }
  0x5b   : > { %s4011_s1 = scalar_select %p58_p12, %s3804_s18, %s60_s0  }
  0x5c   : > { %s3336_s22 = scalar_select %p3992_p7, %s3812_s20, 0 }
  0x5d   : > { %s4532_s27 = smov (!%p3358_p9, %s3335_s27), [#allocation13]  ;;  %p3676_p1 = pneg %p4003_p10 }
  0x5e   : > { %s4534_s22 = smov (!%p3358_p9, %s3336_s22), 0  ;;  %s3679_s10 = scalar_lea.hbm %s4471_s2, 16384 }
  0x5f   : > { %s263_s30 = sld [smem:[%s4532_s27 + %s4534_s22]] }
  0x65   : > { %s2785_s16 = sshll.u32 %s263_s30, 2 }
  0x66   : > { %s270_s23 = sadd.s32 %s2963_s8, %s2785_s16 }
  0x67   : > { %s2787_s29 = sshll.u32 %s270_s23, 6 }
  0x68   : > { %s4022_s0 = scalar_lea.hbm %s4471_s2, %s2787_s29 }
  0x69   : > { %s3674_s27 = scalar_lea.hbm %s4022_s0, 8192  ;;  %p3680_p6 = scmp.lt.u32.totalorder %s4022_s0, %s4471_s2 }
  0x6a   : > { %p3675_p0 = scmp.ne.s32.totalorder %s4022_s0, %s3674_s27  ;;  %p3681_p8 = scmp.lt.u32.totalorder %s3679_s10, %s3674_s27 }
  0x6b   : > { %p3683_p13 = scmp.lt.u32.totalorder %s3674_s27, %s4022_s0 }
  0x6c   : > { %p3677_p2 = pnand %p3676_p1, %p3675_p0  ;;  %p3682_p11 = por %p3681_p8, %p3680_p6 }
  0x6e   : > { %p3678_p4 = pneg %p3677_p2  ;;  %p3684_p3 = por %p3683_p13, %p3682_p11 }
  0x70   : > { %p3685_p5 = pnand %p3684_p3, %p3678_p4 }
  0x72   : > { %3688 = shalt.err (!%p3685_p5)
}
  0x73   : > { %s3689_s11 = scalar_lea.vmem %s4017_s21, 8192  ;;  %s3823_s16 = smov [#allocation6]  }
  0x74   : > { %p3690_p7 = scmp.ne.s32.totalorder %s4017_s21, %s3689_s11  ;;  %s3694_s23 = sshll.u32 %s3823_s16, 4  ;;  %s3695_s23 = int_to_ptr.vmem [resolvable:$false] %s3694_s23 }
  0x75   : > { %s3696_s29 = scalar_lea.vmem %s3695_s23, 16384  ;;  %p3697_p0 = scmp.lt.s32.totalorder %s4017_s21, %s3695_s23 }
  0x76   : > { %p3692_p9 = pnand %p3690_p7, %p3676_p1  ;;  %p3698_p2 = scmp.lt.s32.totalorder %s3696_s29, %s3689_s11 }
  0x78   : > { %p3693_p12 = pneg %p3692_p9  ;;  %p3699_p6 = por %p3698_p2, %p3697_p0 }
  0x7a   : > { %p3700_p8 = pnand %p3699_p6, %p3693_p12 }
  0x7c   : > { %3703 = shalt.err (!%p3700_p8)
}
  0x7d   : > { %s3824_s6 = smov 256   ;;  %s3825_s13 = smov 16  }
  0x7e   : > { %3352 = dma.hbm_to_vmem [thread:$0]  (!%p4003_p10), %s4022_s0, 8192, %s4017_s21, %s4024_s9, %s3824_s6, %s3824_s6, %s3825_s13  }
  0x7f   : > { %p4508_p1 = scmp.ne.s32.totalorder %s4501_s28, 0 }
  0x80   : > { %s305_s27 = sand.u32 (!%p4508_p1), 1, %s3800_s17   ;;  %p4509_p4 = scmp.ne.s32.totalorder (!%p4508_p1), %s4497_s25, 0 }
  0x81   : > { %303 = sbr.rel (%p4508_p1) target bundleno = 962 (0x3c2), region = 44  ;;  %s2789_s8 = sshll.u32 (!%p4508_p1), %s305_s27, 9 }
  0x82   : > { %s306_s15 = scalar_lea.sflag (!%p4508_p1), [#allocation7], %s305_s27  ;;  %s4055_s10 = scalar_lea.vmem (!%p4508_p1), [#allocation6], %s2789_s8 }
  0x88   : > { %3771 = dma.done.wait (%p4509_p4), %s306_s15, 8192  }
  0x89   : > { %3773 = vsyncadd (%p4509_p4), %s306_s15, 4294959104  ;;  %p4510_p11 = scmp.ne.s32.totalorder %s4496_s24, 0 }
  0x8b   : > { %3775 = dma.done.wait (%p4510_p11), [#allocation10], 4096  }
  0x8c   : > { %3777 = vsyncadd (%p4510_p11), [#allocation10], 4294963200  ;;  %s349_s21 = sand.u32 1, %s3788_s14   ;;  %s2792_s28 = sshll.u32 %s3808_s19, 5  ;;  %v3826_v0 = vmov 0.0  }
  0x8d   : > { %s4068_s12 = sld [smem:[#allocation4 + %s3808_s19]]  ;;  %s4072_s0 = sshll.u32 %s349_s21, 8  ;;  %374 = vst [vmem:[#allocation2] sm:$0xff] %v3826_v0  ;;  %375 = vst [vmem:[#allocation2 + $0x10] sm:$0xff] %v3826_v0 }
  0x8e   : > { %376 = vst [vmem:[#allocation2 + $0x20] sm:$0xff] %v3826_v0  ;;  %377 = vst [vmem:[#allocation2 + $0x30] sm:$0xff] %v3826_v0  ;;  %p357_p10 = scmp.lt.s32.totalorder %s2792_s28, 63  ;;  %s4105_s29 = scalar_lea.vmem [#allocation11], %s4072_s0 }
  0x8f   : > { %378 = vst [vmem:[#allocation2 + $0x40] sm:$0xff] %v3826_v0  ;;  %379 = vst [vmem:[#allocation2 + $0x50] sm:$0xff] %v3826_v0 }
  0x90   : > { %380 = vst [vmem:[#allocation2 + $0x60] sm:$0xff] %v3826_v0  ;;  %381 = vst [vmem:[#allocation2 + $0x70] sm:$0xff] %v3826_v0  ;;  %s4536_s28 = smov (!%p357_p10, %s2792_s28), 63 }
  0x91   : > { %382 = vst [vmem:[#allocation2 + $0x80] sm:$0xff] %v3826_v0  ;;  %383 = vst [vmem:[#allocation2 + $0x90] sm:$0xff] %v3826_v0  ;;  %s2793_s24 = sshll.u32 %s4536_s28, 2  ;;  %s2795_s25 = sshll.u32 %s4536_s28, 3 }
  0x92   : > { %384 = vst [vmem:[#allocation2 + $0xa0] sm:$0xff] %v3826_v0  ;;  %385 = vst [vmem:[#allocation2 + $0xb0] sm:$0xff] %v3826_v0  ;;  %s4081_s22 = scalar_lea.vmem %s4473_s4, %s2793_s24  ;;  %s4086_s23 = scalar_lea.vmem %s4474_s5, %s2795_s25 }
  0x93   : > { %386 = vst [vmem:[#allocation2 + $0xc0] sm:$0xff] %v3826_v0  ;;  %387 = vst [vmem:[#allocation2 + $0xd0] sm:$0xff] %v3826_v0  ;;  %v2999_v1 = vld [vmem:[%s4081_s22] sm:$0xff]   ;;  %v3062_v2 = vld [vmem:[%s4081_s22 + $0x8] sm:$0xff]   ;;  %p2796_p13 = scmp.eq.s32.totalorder %s4068_s12, 0 }
  0x94   : > { %388 = vst [vmem:[#allocation2 + $0xe0] sm:$0xff] %v3826_v0  ;;  %389 = vst [vmem:[#allocation2 + $0xf0] sm:$0xff] %v3826_v0  ;;  %v3063_v3 = vld [vmem:[%s4081_s22 + $0x10] sm:$0xff]   ;;  %v3000_v4 = vunpack.c.l.bf16 %v2999_v1  ;;  %v3001_v5 = vunpack.c.h.bf16 %v2999_v1  ;;  %v3004_v6 = vunpack.c.l.bf16 %v3062_v2  ;;  %v3005_v7 = vunpack.c.h.bf16 %v3062_v2  ;;  %v3064_v8 = vld [vmem:[%s4081_s22 + $0x18] sm:$0xff]  }
  0x95   : > { %390 = vst [vmem:[#allocation2 + $0x100] sm:$0xff] %v3826_v0  ;;  %391 = vst [vmem:[#allocation2 + $0x110] sm:$0xff] %v3826_v0  ;;  %v3065_v9 = vld [vmem:[%s4081_s22 + $0x20] sm:$0xff]   ;;  %v3066_v10 = vld [vmem:[%s4081_s22 + $0x28] sm:$0xff]   ;;  %v3008_v11 = vunpack.c.l.bf16 %v3063_v3  ;;  %v3009_v12 = vunpack.c.h.bf16 %v3063_v3  ;;  %v3012_v13 = vunpack.c.l.bf16 %v3064_v8  ;;  %v3013_v14 = vunpack.c.h.bf16 %v3064_v8 }
  0x96   : > { %392 = vst [vmem:[#allocation2 + $0x120] sm:$0xff] %v3826_v0  ;;  %393 = vst [vmem:[#allocation2 + $0x130] sm:$0xff] %v3826_v0  ;;  %v3067_v15 = vld [vmem:[%s4081_s22 + $0x30] sm:$0xff]   ;;  %v3068_v16 = vld [vmem:[%s4081_s22 + $0x38] sm:$0xff]   ;;  %v3016_v18 = vunpack.c.l.bf16 %v3065_v9  ;;  %v3017_v19 = vunpack.c.h.bf16 %v3065_v9  ;;  %v3020_v20 = vunpack.c.l.bf16 %v3066_v10  ;;  %v3021_v21 = vunpack.c.h.bf16 %v3066_v10 }
  0x97   : > { %394 = vst [vmem:[#allocation2 + $0x140] sm:$0xff] %v3826_v0  ;;  %395 = vst [vmem:[#allocation2 + $0x150] sm:$0xff] %v3826_v0  ;;  %v3069_v17 = vld [vmem:[%s4081_s22 + $0x40] sm:$0xff]   ;;  %v3070_v22 = vld [vmem:[%s4081_s22 + $0x48] sm:$0xff]   ;;  %v3024_v25 = vunpack.c.l.bf16 %v3067_v15  ;;  %v3025_v26 = vunpack.c.h.bf16 %v3067_v15  ;;  %v3028_v27 = vunpack.c.l.bf16 %v3068_v16  ;;  %v3029_v28 = vunpack.c.h.bf16 %v3068_v16 }
  0x98   : > { %396 = vst [vmem:[#allocation2 + $0x160] sm:$0xff] %v3826_v0  ;;  %397 = vst [vmem:[#allocation2 + $0x170] sm:$0xff] %v3826_v0  ;;  %v3071_v23 = vld [vmem:[%s4081_s22 + $0x50] sm:$0xff]   ;;  %v3072_v24 = vld [vmem:[%s4081_s22 + $0x58] sm:$0xff]   ;;  %v3032_v31 = vunpack.c.l.bf16 %v3069_v17  ;;  %v3033_v32 = vunpack.c.h.bf16 %v3069_v17  ;;  %v3036_v33 = vunpack.c.l.bf16 %v3070_v22  ;;  %v3037_v34 = vunpack.c.h.bf16 %v3070_v22 }
  0x99   : > { %398 = vst [vmem:[#allocation2 + $0x180] sm:$0xff] %v3826_v0  ;;  %399 = vst [vmem:[#allocation2 + $0x190] sm:$0xff] %v3826_v0  ;;  %v3073_v29 = vld [vmem:[%s4081_s22 + $0x60] sm:$0xff]   ;;  %v3074_v30 = vld [vmem:[%s4081_s22 + $0x68] sm:$0xff]   ;;  %v3040_v37 = vunpack.c.l.bf16 %v3071_v23  ;;  %v3041_v38 = vunpack.c.h.bf16 %v3071_v23  ;;  %v3044_v39 = vunpack.c.l.bf16 %v3072_v24  ;;  %v3045_v40 = vunpack.c.h.bf16 %v3072_v24 }
  0x9a   : > { %400 = vst [vmem:[#allocation2 + $0x1a0] sm:$0xff] %v3826_v0  ;;  %401 = vst [vmem:[#allocation2 + $0x1b0] sm:$0xff] %v3826_v0  ;;  %v3075_v35 = vld [vmem:[%s4081_s22 + $0x70] sm:$0xff]   ;;  %v3076_v36 = vld [vmem:[%s4081_s22 + $0x78] sm:$0xff]   ;;  %v3048_v41 = vunpack.c.l.bf16 %v3073_v29  ;;  %v3049_v42 = vunpack.c.h.bf16 %v3073_v29  ;;  %v3052_v43 = vunpack.c.l.bf16 %v3074_v30  ;;  %v3053_v44 = vunpack.c.h.bf16 %v3074_v30 }
  0x9b   : > { %402 = vst [vmem:[#allocation2 + $0x1c0] sm:$0xff] %v3826_v0  ;;  %403 = vst [vmem:[#allocation2 + $0x1d0] sm:$0xff] %v3826_v0  ;;  %v3056_v45 = vunpack.c.l.bf16 %v3075_v35  ;;  %v3057_v46 = vunpack.c.h.bf16 %v3075_v35  ;;  %v3060_v47 = vunpack.c.l.bf16 %v3076_v36  ;;  %v3061_v48 = vunpack.c.h.bf16 %v3076_v36  ;;  %v3444_v49 = vld [vmem:[%s4472_s3 + $0x40] sm:$0xff] (!%p2796_p13)   ;;  %v3448_v53 = vld [vmem:[%s4472_s3 + $0x48] sm:$0xff] (!%p2796_p13)  }
  0x9c   : > { %404 = vst [vmem:[#allocation2 + $0x1e0] sm:$0xff] %v3826_v0  ;;  %405 = vst [vmem:[#allocation2 + $0x1f0] sm:$0xff] %v3826_v0  ;;  %v3445_v50 = vld [vmem:[%s4472_s3 + $0xc0] sm:$0xff] (!%p2796_p13)   ;;  %3077 = vmatprep.subr.bf16.mxu0 (!%p2796_p13), %v3444_v49  ;;  %v3449_v54 = vld [vmem:[%s4472_s3 + $0xc8] sm:$0xff] (!%p2796_p13)  }
  0x9d   : > { %470 = vst [vmem:[#allocation2 + $0x8] sm:$0xff] %v3000_v4  ;;  %471 = vst [vmem:[#allocation2 + $0x18] sm:$0xff] %v3001_v5  ;;  %v3446_v51 = vld [vmem:[%s4472_s3] sm:$0xff] (!%p2796_p13)   ;;  %3189 = vmatprep.subr.bf16.mxu1 (!%p2796_p13), %v3445_v50  ;;  %v3450_v55 = vld [vmem:[%s4472_s3 + $0x8] sm:$0xff] (!%p2796_p13)  }
  0x9e   : > { %472 = vst [vmem:[#allocation2 + $0x28] sm:$0xff] %v3004_v6  ;;  %473 = vst [vmem:[#allocation2 + $0x38] sm:$0xff] %v3005_v7  ;;  %v3447_v52 = vld [vmem:[%s4472_s3 + $0x80] sm:$0xff] (!%p2796_p13)   ;;  %3078 = vmatpush3.bf16.msra.mxu0 (!%p2796_p13), %v3446_v51  ;;  %v3451_v56 = vld [vmem:[%s4472_s3 + $0x88] sm:$0xff] (!%p2796_p13)  }
  0x9f   : > { %474 = vst [vmem:[#allocation2 + $0x48] sm:$0xff] %v3008_v11  ;;  %475 = vst [vmem:[#allocation2 + $0x58] sm:$0xff] %v3009_v12  ;;  %3190 = vmatpush3.bf16.msra.mxu1 (!%p2796_p13), %v3447_v52  ;;  %3079 = vmatprep.subr.bf16.mxu0 (!%p2796_p13), %v3448_v53  ;;  %v3452_v57 = vld [vmem:[%s4472_s3 + $0x50] sm:$0xff] (!%p2796_p13)   ;;  %v3456_v61 = vld [vmem:[%s4472_s3 + $0x58] sm:$0xff] (!%p2796_p13)  }
  0xa0   : > { %476 = vst [vmem:[#allocation2 + $0x68] sm:$0xff] %v3012_v13  ;;  %477 = vst [vmem:[#allocation2 + $0x78] sm:$0xff] %v3013_v14  ;;  %3191 = vmatprep.subr.bf16.mxu1 (!%p2796_p13), %v3449_v54  ;;  %v3453_v58 = vld [vmem:[%s4472_s3 + $0xd0] sm:$0xff] (!%p2796_p13)   ;;  %v3457_v62 = vld [vmem:[%s4472_s3 + $0xd8] sm:$0xff] (!%p2796_p13)  }
  0xa1   : > { %478 = vst [vmem:[#allocation2 + $0x88] sm:$0xff] %v3016_v18  ;;  %479 = vst [vmem:[#allocation2 + $0x98] sm:$0xff] %v3017_v19  ;;  %v3454_v59 = vld [vmem:[%s4472_s3 + $0x10] sm:$0xff] (!%p2796_p13)   ;;  %v3458_v63 = vld [vmem:[%s4472_s3 + $0x18] sm:$0xff] (!%p2796_p13)  }
  0xa2   : > { %480 = vst [vmem:[#allocation2 + $0xa8] sm:$0xff] %v3020_v20  ;;  %481 = vst [vmem:[#allocation2 + $0xb8] sm:$0xff] %v3021_v21  ;;  %3080 = vmatpush3.bf16.msra.mxu0 (!%p2796_p13), %v3450_v55  ;;  %v3455_v60 = vld [vmem:[%s4472_s3 + $0x90] sm:$0xff] (!%p2796_p13)   ;;  %v3459_v0 = vld [vmem:[%s4472_s3 + $0x98] sm:$0xff] (!%p2796_p13)  }
  0xa3   : > { %482 = vst [vmem:[#allocation2 + $0xc8] sm:$0xff] %v3024_v25  ;;  %483 = vst [vmem:[#allocation2 + $0xd8] sm:$0xff] %v3025_v26  ;;  %3192 = vmatpush3.bf16.msra.mxu1 (!%p2796_p13), %v3451_v56  ;;  %3081 = vmatprep.subr.bf16.mxu0 (!%p2796_p13), %v3452_v57  ;;  %v3460_v1 = vld [vmem:[%s4472_s3 + $0x60] sm:$0xff] (!%p2796_p13)   ;;  %v3464_v5 = vld [vmem:[%s4472_s3 + $0x68] sm:$0xff] (!%p2796_p13)  }
  0xa4   : > { %484 = vst [vmem:[#allocation2 + $0xe8] sm:$0xff] %v3028_v27  ;;  %485 = vst [vmem:[#allocation2 + $0xf8] sm:$0xff] %v3029_v28  ;;  %3193 = vmatprep.subr.bf16.mxu1 (!%p2796_p13), %v3453_v58  ;;  %v3461_v2 = vld [vmem:[%s4472_s3 + $0xe0] sm:$0xff] (!%p2796_p13)   ;;  %v3465_v6 = vld [vmem:[%s4472_s3 + $0xe8] sm:$0xff] (!%p2796_p13)  }
  0xa5   : > { %486 = vst [vmem:[#allocation2 + $0x108] sm:$0xff] %v3032_v31  ;;  %487 = vst [vmem:[#allocation2 + $0x118] sm:$0xff] %v3033_v32  ;;  %v3462_v3 = vld [vmem:[%s4472_s3 + $0x20] sm:$0xff] (!%p2796_p13)   ;;  %v3466_v7 = vld [vmem:[%s4472_s3 + $0x28] sm:$0xff] (!%p2796_p13)  }
  0xa6   : > { %488 = vst [vmem:[#allocation2 + $0x128] sm:$0xff] %v3036_v33  ;;  %489 = vst [vmem:[#allocation2 + $0x138] sm:$0xff] %v3037_v34  ;;  %507 = sbr.rel (%p2796_p13) target bundleno = 532 (0x214), region = 60  ;;  %3082 = vmatpush3.bf16.msra.mxu0 (!%p2796_p13), %v3454_v59  ;;  %v3463_v4 = vld [vmem:[%s4472_s3 + $0xa0] sm:$0xff] (!%p2796_p13)   ;;  %v3467_v8 = vld [vmem:[%s4472_s3 + $0xa8] sm:$0xff] (!%p2796_p13)  }
  0xa7   : > { %490 = vst [vmem:[#allocation2 + $0x148] sm:$0xff] %v3040_v37  ;;  %491 = vst [vmem:[#allocation2 + $0x158] sm:$0xff] %v3041_v38  ;;  %3194 = vmatpush3.bf16.msra.mxu1 (!%p2796_p13), %v3455_v60  ;;  %3083 = vmatprep.subr.bf16.mxu0 (!%p2796_p13), %v3456_v61  ;;  %v3468_v9 = vld [vmem:[%s4472_s3 + $0x70] sm:$0xff] (!%p2796_p13)   ;;  %v3472_v13 = vld [vmem:[%s4472_s3 + $0x78] sm:$0xff] (!%p2796_p13)  }
  0xa8   : > { %492 = vst [vmem:[#allocation2 + $0x168] sm:$0xff] %v3044_v39  ;;  %493 = vst [vmem:[#allocation2 + $0x178] sm:$0xff] %v3045_v40  ;;  %3195 = vmatprep.subr.bf16.mxu1 (!%p2796_p13), %v3457_v62  ;;  %v3469_v10 = vld [vmem:[%s4472_s3 + $0xf0] sm:$0xff] (!%p2796_p13)   ;;  %v3473_v14 = vld [vmem:[%s4472_s3 + $0xf8] sm:$0xff] (!%p2796_p13)  }
  0xa9   : > { %494 = vst [vmem:[#allocation2 + $0x188] sm:$0xff] %v3048_v41  ;;  %495 = vst [vmem:[#allocation2 + $0x198] sm:$0xff] %v3049_v42  ;;  %v3470_v11 = vld [vmem:[%s4472_s3 + $0x30] sm:$0xff] (!%p2796_p13)   ;;  %v3474_v15 = vld [vmem:[%s4472_s3 + $0x38] sm:$0xff] (!%p2796_p13)  }
  0xaa   : > { %496 = vst [vmem:[#allocation2 + $0x1a8] sm:$0xff] %v3052_v43  ;;  %497 = vst [vmem:[#allocation2 + $0x1b8] sm:$0xff] %v3053_v44  ;;  %3084 = vmatpush3.bf16.msra.mxu0 (!%p2796_p13), %v3458_v63  ;;  %v3471_v12 = vld [vmem:[%s4472_s3 + $0xb0] sm:$0xff] (!%p2796_p13)   ;;  %v3475_v16 = vld [vmem:[%s4472_s3 + $0xb8] sm:$0xff] (!%p2796_p13)  }
  0xab   : > { %498 = vst [vmem:[#allocation2 + $0x1c8] sm:$0xff] %v3056_v45  ;;  %499 = vst [vmem:[#allocation2 + $0x1d8] sm:$0xff] %v3057_v46  ;;  %3196 = vmatpush3.bf16.msra.mxu1 (!%p2796_p13), %v3459_v0  ;;  %3085 = vmatprep.subr.bf16.mxu0 (!%p2796_p13), %v3460_v1  ;;  %v3476_v17 = vld [vmem:[%s4055_s10] ss:$16 sps:$4 sm:$0xff] (!%p2796_p13)   ;;  %v3478_v18 = vld [vmem:[%s4055_s10 + $0x4] ss:$16 sps:$4 sm:$0xff] (!%p2796_p13)  }
  0xac   : > { %500 = vst [vmem:[#allocation2 + $0x1e8] sm:$0xff] %v3060_v47  ;;  %501 = vst [vmem:[#allocation2 + $0x1f8] sm:$0xff] %v3061_v48  ;;  %3197 = vmatprep.subr.bf16.mxu1 (!%p2796_p13), %v3461_v2  ;;  %v3479_v19 = vld [vmem:[%s4055_s10 + $0x8] ss:$16 sps:$4 sm:$0xff] (!%p2796_p13)   ;;  %v3481_v20 = vld [vmem:[%s4055_s10 + $0xc] ss:$16 sps:$4 sm:$0xff] (!%p2796_p13)   ;;  %1217 = vmatprep.mubr.bf16.mxu0 (!%p2796_p13), %v3478_v18 }
  0xad   : > { %v3482_v21 = vld [vmem:[%s4055_s10 + $0x24] ss:$16 sps:$4 sm:$0xff]   ;;  %1378 = vmatprep.mubr.bf16.mxu1 %v3481_v20  ;;  %v3484_v22 = vld [vmem:[%s4055_s10 + $0x2c] ss:$16 sps:$4 sm:$0xff]   ;;  %v3486_v23 = vld [vmem:[%s4055_s10 + $0x20] ss:$16 sps:$4 sm:$0xff]  }
  0xae   : > { %3086 = vmatpush3.bf16.msra.mxu0 %v3462_v3  ;;  %v3487_v24 = vld [vmem:[%s4055_s10 + $0x28] ss:$16 sps:$4 sm:$0xff]   ;;  %v3488_v25 = vld [vmem:[%s4055_s10 + $0x44] ss:$16 sps:$4 sm:$0xff]   ;;  %v3490_v26 = vld [vmem:[%s4055_s10 + $0x4c] ss:$16 sps:$4 sm:$0xff]  }
  0xaf   : > { %3198 = vmatpush3.bf16.msra.mxu1 %v3463_v4  ;;  %3087 = vmatprep.subr.bf16.mxu0 %v3464_v5  ;;  %v3492_v27 = vld [vmem:[%s4055_s10 + $0x40] ss:$16 sps:$4 sm:$0xff]   ;;  %v3493_v28 = vld [vmem:[%s4055_s10 + $0x48] ss:$16 sps:$4 sm:$0xff]   ;;  %v3494_v29 = vld [vmem:[%s4055_s10 + $0x64] ss:$16 sps:$4 sm:$0xff]  }
  0xb0   : > { %3199 = vmatprep.subr.bf16.mxu1 %v3465_v6  ;;  %v3496_v30 = vld [vmem:[%s4055_s10 + $0x6c] ss:$16 sps:$4 sm:$0xff]   ;;  %v3498_v31 = vld [vmem:[%s4055_s10 + $0x60] ss:$16 sps:$4 sm:$0xff]   ;;  %v3499_v32 = vld [vmem:[%s4055_s10 + $0x68] ss:$16 sps:$4 sm:$0xff]  }
  0xb1   : > { %v3500_v33 = vld [vmem:[%s4055_s10 + $0x84] ss:$16 sps:$4 sm:$0xff]   ;;  %v3502_v34 = vld [vmem:[%s4055_s10 + $0x8c] ss:$16 sps:$4 sm:$0xff]   ;;  %v3504_v35 = vld [vmem:[%s4055_s10 + $0x80] ss:$16 sps:$4 sm:$0xff]  }
  0xb2   : > { %3088 = vmatpush3.bf16.msra.mxu0 %v3466_v7  ;;  %v3505_v36 = vld [vmem:[%s4055_s10 + $0x88] ss:$16 sps:$4 sm:$0xff]   ;;  %v3506_v37 = vld [vmem:[%s4055_s10 + $0xa4] ss:$16 sps:$4 sm:$0xff]   ;;  %v3508_v38 = vld [vmem:[%s4055_s10 + $0xac] ss:$16 sps:$4 sm:$0xff]  }
  0xb3   : > { %3200 = vmatpush3.bf16.msra.mxu1 %v3467_v8  ;;  %3089 = vmatprep.subr.bf16.mxu0 %v3468_v9  ;;  %v3510_v39 = vld [vmem:[%s4055_s10 + $0xa0] ss:$16 sps:$4 sm:$0xff]   ;;  %v3511_v40 = vld [vmem:[%s4055_s10 + $0xa8] ss:$16 sps:$4 sm:$0xff]   ;;  %v3512_v41 = vld [vmem:[%s4055_s10 + $0xc4] ss:$16 sps:$4 sm:$0xff]  }
  0xb4   : > { %3201 = vmatprep.subr.bf16.mxu1 %v3469_v10  ;;  %v3514_v42 = vld [vmem:[%s4055_s10 + $0xcc] ss:$16 sps:$4 sm:$0xff]   ;;  %v3516_v43 = vld [vmem:[%s4055_s10 + $0xc0] ss:$16 sps:$4 sm:$0xff]   ;;  %v3517_v44 = vld [vmem:[%s4055_s10 + $0xc8] ss:$16 sps:$4 sm:$0xff]  }
  0xb5   : > { %v3518_v45 = vld [vmem:[%s4055_s10 + $0xe4] ss:$16 sps:$4 sm:$0xff]   ;;  %v3520_v46 = vld [vmem:[%s4055_s10 + $0xec] ss:$16 sps:$4 sm:$0xff]   ;;  %v3522_v47 = vld [vmem:[%s4055_s10 + $0xe0] ss:$16 sps:$4 sm:$0xff]  }
  0xb6   : > { %3090 = vmatpush3.bf16.msra.mxu0 %v3470_v11  ;;  %v3523_v48 = vld [vmem:[%s4055_s10 + $0xe8] ss:$16 sps:$4 sm:$0xff]   ;;  %v3524_v49 = vld [vmem:[%s4055_s10 + $0x104] ss:$16 sps:$4 sm:$0xff]   ;;  %v3526_v50 = vld [vmem:[%s4055_s10 + $0x10c] ss:$16 sps:$4 sm:$0xff]  }
  0xb7   : > { %3202 = vmatpush3.bf16.msra.mxu1 %v3471_v12  ;;  %3091 = vmatprep.subr.bf16.mxu0 %v3472_v13  ;;  %v3528_v51 = vld [vmem:[%s4055_s10 + $0x100] ss:$16 sps:$4 sm:$0xff]   ;;  %v3529_v52 = vld [vmem:[%s4055_s10 + $0x108] ss:$16 sps:$4 sm:$0xff]   ;;  %v3530_v53 = vld [vmem:[%s4055_s10 + $0x124] ss:$16 sps:$4 sm:$0xff]  }
  0xb8   : > { %3203 = vmatprep.subr.bf16.mxu1 %v3473_v14  ;;  %v3532_v54 = vld [vmem:[%s4055_s10 + $0x12c] ss:$16 sps:$4 sm:$0xff]   ;;  %v3534_v55 = vld [vmem:[%s4055_s10 + $0x120] ss:$16 sps:$4 sm:$0xff]   ;;  %v3535_v56 = vld [vmem:[%s4055_s10 + $0x128] ss:$16 sps:$4 sm:$0xff]  }
  0xb9   : > { %v3536_v57 = vld [vmem:[%s4055_s10 + $0x144] ss:$16 sps:$4 sm:$0xff]   ;;  %v3538_v58 = vld [vmem:[%s4055_s10 + $0x14c] ss:$16 sps:$4 sm:$0xff]   ;;  %v3540_v59 = vld [vmem:[%s4055_s10 + $0x140] ss:$16 sps:$4 sm:$0xff]  }
  0xba   : > { %3092 = vmatpush3.bf16.msra.mxu0 %v3474_v15  ;;  %v3541_v60 = vld [vmem:[%s4055_s10 + $0x148] ss:$16 sps:$4 sm:$0xff]   ;;  %v3542_v61 = vld [vmem:[%s4055_s10 + $0x164] ss:$16 sps:$4 sm:$0xff]   ;;  %v3544_v62 = vld [vmem:[%s4055_s10 + $0x16c] ss:$16 sps:$4 sm:$0xff]  }
  0xbb   : > { %3204 = vmatpush3.bf16.msra.mxu1 %v3475_v16  ;;  %v3546_v63 = vld [vmem:[%s4055_s10 + $0x160] ss:$16 sps:$4 sm:$0xff]   ;;  %v3547_v0 = vld [vmem:[%s4055_s10 + $0x168] ss:$16 sps:$4 sm:$0xff]   ;;  %v3548_v1 = vld [vmem:[%s4055_s10 + $0x184] ss:$16 sps:$4 sm:$0xff]  }
  0xbc   : > { %v3550_v2 = vld [vmem:[%s4055_s10 + $0x18c] ss:$16 sps:$4 sm:$0xff]   ;;  %v3552_v3 = vld [vmem:[%s4055_s10 + $0x180] ss:$16 sps:$4 sm:$0xff]   ;;  %v3553_v4 = vld [vmem:[%s4055_s10 + $0x188] ss:$16 sps:$4 sm:$0xff]  }
  0xbd   : > { %1218 = vmatmul.mubr.bf16.vlgmr.msra.gmra.mrb[0].mxu0 %v3476_v17  ;;  %v3554_v5 = vld [vmem:[%s4055_s10 + $0x1a4] ss:$16 sps:$4 sm:$0xff]   ;;  %v3556_v6 = vld [vmem:[%s4055_s10 + $0x1ac] ss:$16 sps:$4 sm:$0xff]   ;;  %v3558_v7 = vld [vmem:[%s4055_s10 + $0x1a0] ss:$16 sps:$4 sm:$0xff]  }
  0xbe   : > { %1379 = vmatmul.mubr.bf16.vlgmr.msra.gmra.mrb[0].mxu1 %v3479_v19  ;;  %1225 = vmatprep.mubr.bf16.mxu0 %v3482_v21  ;;  %v3559_v8 = vld [vmem:[%s4055_s10 + $0x1a8] ss:$16 sps:$4 sm:$0xff]   ;;  %v3560_v9 = vld [vmem:[%s4055_s10 + $0x1c4] ss:$16 sps:$4 sm:$0xff]   ;;  %v3562_v10 = vld [vmem:[%s4055_s10 + $0x1cc] ss:$16 sps:$4 sm:$0xff]  }
  0xbf   : > { %1386 = vmatprep.mubr.bf16.mxu1 %v3484_v22  ;;  %v3564_v11 = vld [vmem:[%s4055_s10 + $0x1c0] ss:$16 sps:$4 sm:$0xff]   ;;  %v3565_v12 = vld [vmem:[%s4055_s10 + $0x1c8] ss:$16 sps:$4 sm:$0xff]   ;;  %v3566_v13 = vld [vmem:[%s4055_s10 + $0x1e4] ss:$16 sps:$4 sm:$0xff]  }
  0xc0   : > { %v3568_v14 = vld [vmem:[%s4055_s10 + $0x1ec] ss:$16 sps:$4 sm:$0xff]   ;;  %v3570_v15 = vld [vmem:[%s4055_s10 + $0x1e0] ss:$16 sps:$4 sm:$0xff]   ;;  %v3571_v16 = vld [vmem:[%s4055_s10 + $0x1e8] ss:$16 sps:$4 sm:$0xff]  }
  0xc5   : > { %1226 = vmatmul.mubr.bf16.gmra.mrb[4].mxu0 %v3486_v23 }
  0xc6   : > { %1387 = vmatmul.mubr.bf16.gmra.mrb[4].mxu1 %v3487_v24  ;;  %1233 = vmatprep.mubr.bf16.mxu0 %v3488_v25 }
  0xc7   : > { %1394 = vmatprep.mubr.bf16.mxu1 %v3490_v26  ;;  %v577_v26 = vld [vmem:[#allocation2] sm:$0xff] }
  0xcd   : > { %1234 = vmatmul.mubr.bf16.gmra.mrb[8].mxu0 %v3492_v27 }
  0xce   : > { %1395 = vmatmul.mubr.bf16.gmra.mrb[8].mxu1 %v3493_v28  ;;  %1241 = vmatprep.mubr.bf16.mxu0 %v3494_v29 }
  0xcf   : > { %1402 = vmatprep.mubr.bf16.mxu1 %v3496_v30 }
  0xd5   : > { %1242 = vmatmul.mubr.bf16.gmra.mrb[12].mxu0 %v3498_v31  ;;  %v578_v31 = vld [vmem:[#allocation2 + $0x10] sm:$0xff] }
  0xd6   : > { %1403 = vmatmul.mubr.bf16.gmra.mrb[12].mxu1 %v3499_v32  ;;  %1249 = vmatprep.mubr.bf16.mxu0 %v3500_v33 }
  0xd7   : > { %1410 = vmatprep.mubr.bf16.mxu1 %v3502_v34 }
  0xdd   : > { %1250 = vmatmul.mubr.bf16.gmra.mrb[16].mxu0 %v3504_v35 }
  0xde   : > { %1411 = vmatmul.mubr.bf16.gmra.mrb[16].mxu1 %v3505_v36  ;;  %1257 = vmatprep.mubr.bf16.mxu0 %v3506_v37 }
  0xdf   : > { %1418 = vmatprep.mubr.bf16.mxu1 %v3508_v38 }
  0xe5   : > { %1258 = vmatmul.mubr.bf16.gmra.mrb[20].mxu0 %v3510_v39 }
  0xe6   : > { %1419 = vmatmul.mubr.bf16.gmra.mrb[20].mxu1 %v3511_v40  ;;  %1265 = vmatprep.mubr.bf16.mxu0 %v3512_v41 }
  0xe7   : > { %1426 = vmatprep.mubr.bf16.mxu1 %v3514_v42 }
  0xed   : > { %1266 = vmatmul.mubr.bf16.gmra.mrb[24].mxu0 %v3516_v43 }
  0xee   : > { %1427 = vmatmul.mubr.bf16.gmra.mrb[24].mxu1 %v3517_v44  ;;  %1273 = vmatprep.mubr.bf16.mxu0 %v3518_v45  ;;  %v579_v44 = vld [vmem:[#allocation2 + $0x20] sm:$0xff] }
  0xef   : > { %1434 = vmatprep.mubr.bf16.mxu1 %v3520_v46 }
  0xf5   : > { %1274 = vmatmul.mubr.bf16.gmra.mrb[28].mxu0 %v3522_v47 }
  0xf6   : > { %1435 = vmatmul.mubr.bf16.gmra.mrb[28].mxu1 %v3523_v48  ;;  %1281 = vmatprep.mubr.bf16.mxu0 %v3524_v49  ;;  %v580_v49 = vld [vmem:[#allocation2 + $0x30] sm:$0xff] }
  0xf7   : > { %1442 = vmatprep.mubr.bf16.mxu1 %v3526_v50 }
  0xfd   : > { %1282 = vmatmul.mubr.bf16.gmra.mrb[32].mxu0 %v3528_v51 }
  0xfe   : > { %1443 = vmatmul.mubr.bf16.gmra.mrb[32].mxu1 %v3529_v52  ;;  %1289 = vmatprep.mubr.bf16.mxu0 %v3530_v53 }
  0xff   : > { %1450 = vmatprep.mubr.bf16.mxu1 %v3532_v54 }
 0x105   : > { %1290 = vmatmul.mubr.bf16.gmra.mrb[36].mxu0 %v3534_v55 }
 0x106   : > { %1451 = vmatmul.mubr.bf16.gmra.mrb[36].mxu1 %v3535_v56  ;;  %1297 = vmatprep.mubr.bf16.mxu0 %v3536_v57 }
 0x107   : > { %1458 = vmatprep.mubr.bf16.mxu1 %v3538_v58 }
 0x10d   : > { %1298 = vmatmul.mubr.bf16.gmra.mrb[40].mxu0 %v3540_v59 }
 0x10e   : > { %1459 = vmatmul.mubr.bf16.gmra.mrb[40].mxu1 %v3541_v60  ;;  %1305 = vmatprep.mubr.bf16.mxu0 %v3542_v61 }
 0x10f   : > { %1466 = vmatprep.mubr.bf16.mxu1 %v3544_v62  ;;  %v581_v62 = vld [vmem:[#allocation2 + $0x40] sm:$0xff] }
 0x115   : > { %1306 = vmatmul.mubr.bf16.gmra.mrb[44].mxu0 %v3546_v63 }
 0x116   : > { %1467 = vmatmul.mubr.bf16.gmra.mrb[44].mxu1 %v3547_v0  ;;  %1313 = vmatprep.mubr.bf16.mxu0 %v3548_v1 }
 0x117   : > { %1474 = vmatprep.mubr.bf16.mxu1 %v3550_v2 }
 0x11d   : > { %1314 = vmatmul.mubr.bf16.gmra.mrb[48].mxu0 %v3552_v3  ;;  %v582_v3 = vld [vmem:[#allocation2 + $0x50] sm:$0xff] }
 0x11e   : > { %1475 = vmatmul.mubr.bf16.gmra.mrb[48].mxu1 %v3553_v4  ;;  %1321 = vmatprep.mubr.bf16.mxu0 %v3554_v5 }
 0x11f   : > { %1482 = vmatprep.mubr.bf16.mxu1 %v3556_v6 }
 0x125   : > { %1322 = vmatmul.mubr.bf16.gmra.mrb[52].mxu0 %v3558_v7 }
 0x126   : > { %1483 = vmatmul.mubr.bf16.gmra.mrb[52].mxu1 %v3559_v8  ;;  %1329 = vmatprep.mubr.bf16.mxu0 %v3560_v9 }
 0x127   : > { %1490 = vmatprep.mubr.bf16.mxu1 %v3562_v10 }
 0x12d   : > { %1330 = vmatmul.mubr.bf16.gmra.mrb[56].mxu0 %v3564_v11 }
 0x12e   : > { %1491 = vmatmul.mubr.bf16.gmra.mrb[56].mxu1 %v3565_v12  ;;  %1337 = vmatprep.mubr.bf16.mxu0 %v3566_v13 }
 0x12f   : > { %1498 = vmatprep.mubr.bf16.mxu1 %v3568_v14 }
 0x135   : > { %1338 = vmatmul.mubr.bf16.gmra.mrb[60].mxu0 %v3570_v15 }
 0x136   : > { %1499 = vmatmul.mubr.bf16.gmra.mrb[60].mxu1 %v3571_v16  ;;  %v583_v16 = vld [vmem:[#allocation2 + $0x60] sm:$0xff] }
 0x190   : > { %v3093_v17 = vpop.f32.mrb[0].mxu0 }
 0x191   : > { %v3205_v18 = vpop.f32.mrb[0].mxu1  ;;  %v3094_v19 = vpop.f32.mrb[1].mxu0 }
 0x192   : > { %v3095_v20 = vadd.f32 %v3094_v19, %v3093_v17  ;;  %v3206_v21 = vpop.f32.mrb[1].mxu1  ;;  %v3096_v22 = vpop.f32.mrb[2].mxu0 }
 0x193   : > { %v3207_v23 = vadd.f32 %v3206_v21, %v3205_v18  ;;  %v3208_v24 = vpop.f32.mrb[2].mxu1  ;;  %v3097_v25 = vpop.f32.mrb[3].mxu0  ;;  %v584_v21 = vld [vmem:[#allocation2 + $0x70] sm:$0xff] }
 0x194   : > { %v3098_v27 = vadd.f32 %v3097_v25, %v3096_v22  ;;  %v3209_v28 = vpop.f32.mrb[3].mxu1 }
 0x195   : > { %v1381_v29 = vadd.f32 %v3207_v23, %v3095_v20  ;;  %v3210_v30 = vadd.f32 %v3209_v28, %v3208_v24 }
 0x197   : > { %v1507_v32 = vadd.f32 %v1381_v29, %v577_v26  ;;  %v1384_v33 = vadd.f32 %v3210_v30, %v3098_v27 }
 0x198   : > { %v3099_v34 = vpop.f32.mrb[4].mxu0 }
 0x199   : > { %1539 = vst [vmem:[#allocation2] sm:$0xff] %v1507_v32  ;;  %v1508_v35 = vadd.f32 %v1384_v33, %v578_v31  ;;  %v3211_v36 = vpop.f32.mrb[4].mxu1  ;;  %v3100_v37 = vpop.f32.mrb[5].mxu0 }
 0x19a   : > { %v3101_v38 = vadd.f32 %v3100_v37, %v3099_v34  ;;  %v3212_v39 = vpop.f32.mrb[5].mxu1  ;;  %v3102_v40 = vpop.f32.mrb[6].mxu0  ;;  %v585_v34 = vld [vmem:[#allocation2 + $0x80] sm:$0xff] }
 0x19b   : > { %1540 = vst [vmem:[#allocation2 + $0x10] sm:$0xff] %v1508_v35  ;;  %v3213_v41 = vadd.f32 %v3212_v39, %v3211_v36  ;;  %v3214_v42 = vpop.f32.mrb[6].mxu1  ;;  %v3103_v43 = vpop.f32.mrb[7].mxu0  ;;  %v586_v39 = vld [vmem:[#allocation2 + $0x90] sm:$0xff] }
 0x19c   : > { %v3104_v45 = vadd.f32 %v3103_v43, %v3102_v40  ;;  %v3215_v46 = vpop.f32.mrb[7].mxu1 }
 0x19d   : > { %v1389_v47 = vadd.f32 %v3213_v41, %v3101_v38  ;;  %v3216_v48 = vadd.f32 %v3215_v46, %v3214_v42 }
 0x19f   : > { %v1509_v50 = vadd.f32 %v1389_v47, %v579_v44  ;;  %v1392_v51 = vadd.f32 %v3216_v48, %v3104_v45 }
 0x1a0   : > { %v3105_v52 = vpop.f32.mrb[8].mxu0 }
 0x1a1   : > { %1541 = vst [vmem:[#allocation2 + $0x20] sm:$0xff] %v1509_v50  ;;  %v1510_v53 = vadd.f32 %v1392_v51, %v580_v49  ;;  %v3217_v54 = vpop.f32.mrb[8].mxu1  ;;  %v3106_v55 = vpop.f32.mrb[9].mxu0 }
 0x1a2   : > { %v3107_v56 = vadd.f32 %v3106_v55, %v3105_v52  ;;  %v3218_v57 = vpop.f32.mrb[9].mxu1  ;;  %v3108_v58 = vpop.f32.mrb[10].mxu0  ;;  %v587_v52 = vld [vmem:[#allocation2 + $0xa0] sm:$0xff] }
 0x1a3   : > { %1542 = vst [vmem:[#allocation2 + $0x30] sm:$0xff] %v1510_v53  ;;  %v3219_v59 = vadd.f32 %v3218_v57, %v3217_v54  ;;  %v3220_v60 = vpop.f32.mrb[10].mxu1  ;;  %v3109_v61 = vpop.f32.mrb[11].mxu0  ;;  %v588_v57 = vld [vmem:[#allocation2 + $0xb0] sm:$0xff] }
 0x1a4   : > { %v3110_v63 = vadd.f32 %v3109_v61, %v3108_v58  ;;  %v3221_v0 = vpop.f32.mrb[11].mxu1 }
 0x1a5   : > { %v1397_v1 = vadd.f32 %v3219_v59, %v3107_v56  ;;  %v3222_v2 = vadd.f32 %v3221_v0, %v3220_v60 }
 0x1a7   : > { %v1511_v4 = vadd.f32 %v1397_v1, %v581_v62  ;;  %v1400_v5 = vadd.f32 %v3222_v2, %v3110_v63 }
 0x1a8   : > { %v3111_v6 = vpop.f32.mrb[12].mxu0 }
 0x1a9   : > { %1543 = vst [vmem:[#allocation2 + $0x40] sm:$0xff] %v1511_v4  ;;  %v1512_v7 = vadd.f32 %v1400_v5, %v582_v3  ;;  %v3223_v8 = vpop.f32.mrb[12].mxu1  ;;  %v3112_v9 = vpop.f32.mrb[13].mxu0 }
 0x1aa   : > { %v3113_v10 = vadd.f32 %v3112_v9, %v3111_v6  ;;  %v3224_v11 = vpop.f32.mrb[13].mxu1  ;;  %v3114_v12 = vpop.f32.mrb[14].mxu0  ;;  %v589_v6 = vld [vmem:[#allocation2 + $0xc0] sm:$0xff] }
 0x1ab   : > { %1544 = vst [vmem:[#allocation2 + $0x50] sm:$0xff] %v1512_v7  ;;  %v3225_v13 = vadd.f32 %v3224_v11, %v3223_v8  ;;  %v3226_v14 = vpop.f32.mrb[14].mxu1  ;;  %v3115_v15 = vpop.f32.mrb[15].mxu0  ;;  %v590_v11 = vld [vmem:[#allocation2 + $0xd0] sm:$0xff] }
 0x1ac   : > { %v3116_v17 = vadd.f32 %v3115_v15, %v3114_v12  ;;  %v3227_v18 = vpop.f32.mrb[15].mxu1 }
 0x1ad   : > { %v1405_v19 = vadd.f32 %v3225_v13, %v3113_v10  ;;  %v3228_v20 = vadd.f32 %v3227_v18, %v3226_v14 }
 0x1af   : > { %v1513_v22 = vadd.f32 %v1405_v19, %v583_v16  ;;  %v1408_v23 = vadd.f32 %v3228_v20, %v3116_v17 }
 0x1b0   : > { %v3117_v24 = vpop.f32.mrb[16].mxu0 }
 0x1b1   : > { %1545 = vst [vmem:[#allocation2 + $0x60] sm:$0xff] %v1513_v22  ;;  %v1514_v25 = vadd.f32 %v1408_v23, %v584_v21  ;;  %v3229_v26 = vpop.f32.mrb[16].mxu1  ;;  %v3118_v27 = vpop.f32.mrb[17].mxu0 }
 0x1b2   : > { %v3119_v28 = vadd.f32 %v3118_v27, %v3117_v24  ;;  %v3230_v29 = vpop.f32.mrb[17].mxu1  ;;  %v3120_v30 = vpop.f32.mrb[18].mxu0  ;;  %v591_v24 = vld [vmem:[#allocation2 + $0xe0] sm:$0xff] }
 0x1b3   : > { %1546 = vst [vmem:[#allocation2 + $0x70] sm:$0xff] %v1514_v25  ;;  %v3231_v31 = vadd.f32 %v3230_v29, %v3229_v26  ;;  %v3232_v32 = vpop.f32.mrb[18].mxu1  ;;  %v3121_v33 = vpop.f32.mrb[19].mxu0  ;;  %v592_v29 = vld [vmem:[#allocation2 + $0xf0] sm:$0xff] }
 0x1b4   : > { %v3122_v35 = vadd.f32 %v3121_v33, %v3120_v30  ;;  %v3233_v36 = vpop.f32.mrb[19].mxu1 }
 0x1b5   : > { %v1413_v37 = vadd.f32 %v3231_v31, %v3119_v28  ;;  %v3234_v38 = vadd.f32 %v3233_v36, %v3232_v32 }
 0x1b7   : > { %v1515_v40 = vadd.f32 %v1413_v37, %v585_v34  ;;  %v1416_v41 = vadd.f32 %v3234_v38, %v3122_v35 }
 0x1b8   : > { %v3123_v42 = vpop.f32.mrb[20].mxu0 }
 0x1b9   : > { %1547 = vst [vmem:[#allocation2 + $0x80] sm:$0xff] %v1515_v40  ;;  %v1516_v43 = vadd.f32 %v1416_v41, %v586_v39  ;;  %v3235_v44 = vpop.f32.mrb[20].mxu1  ;;  %v3124_v45 = vpop.f32.mrb[21].mxu0 }
 0x1ba   : > { %v3125_v46 = vadd.f32 %v3124_v45, %v3123_v42  ;;  %v3236_v47 = vpop.f32.mrb[21].mxu1  ;;  %v3126_v48 = vpop.f32.mrb[22].mxu0  ;;  %v593_v42 = vld [vmem:[#allocation2 + $0x100] sm:$0xff] }
 0x1bb   : > { %1548 = vst [vmem:[#allocation2 + $0x90] sm:$0xff] %v1516_v43  ;;  %v3237_v49 = vadd.f32 %v3236_v47, %v3235_v44  ;;  %v3238_v50 = vpop.f32.mrb[22].mxu1  ;;  %v3127_v51 = vpop.f32.mrb[23].mxu0  ;;  %v594_v47 = vld [vmem:[#allocation2 + $0x110] sm:$0xff] }
 0x1bc   : > { %v3128_v53 = vadd.f32 %v3127_v51, %v3126_v48  ;;  %v3239_v54 = vpop.f32.mrb[23].mxu1 }
 0x1bd   : > { %v1421_v55 = vadd.f32 %v3237_v49, %v3125_v46  ;;  %v3240_v56 = vadd.f32 %v3239_v54, %v3238_v50 }
 0x1bf   : > { %v1517_v58 = vadd.f32 %v1421_v55, %v587_v52  ;;  %v1424_v59 = vadd.f32 %v3240_v56, %v3128_v53 }
 0x1c0   : > { %v3129_v60 = vpop.f32.mrb[24].mxu0 }
 0x1c1   : > { %1549 = vst [vmem:[#allocation2 + $0xa0] sm:$0xff] %v1517_v58  ;;  %v1518_v61 = vadd.f32 %v1424_v59, %v588_v57  ;;  %v3241_v62 = vpop.f32.mrb[24].mxu1  ;;  %v3130_v63 = vpop.f32.mrb[25].mxu0 }
 0x1c2   : > { %v3131_v0 = vadd.f32 %v3130_v63, %v3129_v60  ;;  %v3242_v1 = vpop.f32.mrb[25].mxu1  ;;  %v3132_v2 = vpop.f32.mrb[26].mxu0  ;;  %v595_v60 = vld [vmem:[#allocation2 + $0x120] sm:$0xff] }
 0x1c3   : > { %1550 = vst [vmem:[#allocation2 + $0xb0] sm:$0xff] %v1518_v61  ;;  %v3243_v3 = vadd.f32 %v3242_v1, %v3241_v62  ;;  %v3244_v4 = vpop.f32.mrb[26].mxu1  ;;  %v3133_v5 = vpop.f32.mrb[27].mxu0  ;;  %v596_v1 = vld [vmem:[#allocation2 + $0x130] sm:$0xff] }
 0x1c4   : > { %v3134_v7 = vadd.f32 %v3133_v5, %v3132_v2  ;;  %v3245_v8 = vpop.f32.mrb[27].mxu1 }
 0x1c5   : > { %v1429_v9 = vadd.f32 %v3243_v3, %v3131_v0  ;;  %v3246_v10 = vadd.f32 %v3245_v8, %v3244_v4 }
 0x1c7   : > { %v1519_v12 = vadd.f32 %v1429_v9, %v589_v6  ;;  %v1432_v13 = vadd.f32 %v3246_v10, %v3134_v7 }
 0x1c8   : > { %v3135_v14 = vpop.f32.mrb[28].mxu0 }
 0x1c9   : > { %1551 = vst [vmem:[#allocation2 + $0xc0] sm:$0xff] %v1519_v12  ;;  %v1520_v15 = vadd.f32 %v1432_v13, %v590_v11  ;;  %v3247_v16 = vpop.f32.mrb[28].mxu1  ;;  %v3136_v17 = vpop.f32.mrb[29].mxu0 }
 0x1ca   : > { %v3137_v18 = vadd.f32 %v3136_v17, %v3135_v14  ;;  %v3248_v19 = vpop.f32.mrb[29].mxu1  ;;  %v3138_v20 = vpop.f32.mrb[30].mxu0  ;;  %v597_v14 = vld [vmem:[#allocation2 + $0x140] sm:$0xff] }
 0x1cb   : > { %1552 = vst [vmem:[#allocation2 + $0xd0] sm:$0xff] %v1520_v15  ;;  %v3249_v21 = vadd.f32 %v3248_v19, %v3247_v16  ;;  %v3250_v22 = vpop.f32.mrb[30].mxu1  ;;  %v3139_v23 = vpop.f32.mrb[31].mxu0  ;;  %v598_v19 = vld [vmem:[#allocation2 + $0x150] sm:$0xff] }
 0x1cc   : > { %v3140_v25 = vadd.f32 %v3139_v23, %v3138_v20  ;;  %v3251_v26 = vpop.f32.mrb[31].mxu1 }
 0x1cd   : > { %v1437_v27 = vadd.f32 %v3249_v21, %v3137_v18  ;;  %v3252_v28 = vadd.f32 %v3251_v26, %v3250_v22 }
 0x1cf   : > { %v1521_v30 = vadd.f32 %v1437_v27, %v591_v24  ;;  %v1440_v31 = vadd.f32 %v3252_v28, %v3140_v25 }
 0x1d0   : > { %v3141_v32 = vpop.f32.mrb[32].mxu0 }
 0x1d1   : > { %1553 = vst [vmem:[#allocation2 + $0xe0] sm:$0xff] %v1521_v30  ;;  %v1522_v33 = vadd.f32 %v1440_v31, %v592_v29  ;;  %v3253_v34 = vpop.f32.mrb[32].mxu1  ;;  %v3142_v35 = vpop.f32.mrb[33].mxu0 }
 0x1d2   : > { %v3143_v36 = vadd.f32 %v3142_v35, %v3141_v32  ;;  %v3254_v37 = vpop.f32.mrb[33].mxu1  ;;  %v3144_v38 = vpop.f32.mrb[34].mxu0  ;;  %v599_v32 = vld [vmem:[#allocation2 + $0x160] sm:$0xff] }
 0x1d3   : > { %1554 = vst [vmem:[#allocation2 + $0xf0] sm:$0xff] %v1522_v33  ;;  %v3255_v39 = vadd.f32 %v3254_v37, %v3253_v34  ;;  %v3256_v40 = vpop.f32.mrb[34].mxu1  ;;  %v3145_v41 = vpop.f32.mrb[35].mxu0  ;;  %v600_v37 = vld [vmem:[#allocation2 + $0x170] sm:$0xff] }
 0x1d4   : > { %v3146_v43 = vadd.f32 %v3145_v41, %v3144_v38  ;;  %v3257_v44 = vpop.f32.mrb[35].mxu1 }
 0x1d5   : > { %v1445_v45 = vadd.f32 %v3255_v39, %v3143_v36  ;;  %v3258_v46 = vadd.f32 %v3257_v44, %v3256_v40 }
 0x1d7   : > { %v1523_v48 = vadd.f32 %v1445_v45, %v593_v42  ;;  %v1448_v49 = vadd.f32 %v3258_v46, %v3146_v43 }
 0x1d8   : > { %v3147_v50 = vpop.f32.mrb[36].mxu0 }
 0x1d9   : > { %1555 = vst [vmem:[#allocation2 + $0x100] sm:$0xff] %v1523_v48  ;;  %v1524_v51 = vadd.f32 %v1448_v49, %v594_v47  ;;  %v3259_v52 = vpop.f32.mrb[36].mxu1  ;;  %v3148_v53 = vpop.f32.mrb[37].mxu0 }
 0x1da   : > { %v3149_v54 = vadd.f32 %v3148_v53, %v3147_v50  ;;  %v3260_v55 = vpop.f32.mrb[37].mxu1  ;;  %v3150_v56 = vpop.f32.mrb[38].mxu0  ;;  %v601_v50 = vld [vmem:[#allocation2 + $0x180] sm:$0xff] }
 0x1db   : > { %1556 = vst [vmem:[#allocation2 + $0x110] sm:$0xff] %v1524_v51  ;;  %v3261_v57 = vadd.f32 %v3260_v55, %v3259_v52  ;;  %v3262_v58 = vpop.f32.mrb[38].mxu1  ;;  %v3151_v59 = vpop.f32.mrb[39].mxu0  ;;  %v602_v55 = vld [vmem:[#allocation2 + $0x190] sm:$0xff] }
 0x1dc   : > { %v3152_v61 = vadd.f32 %v3151_v59, %v3150_v56  ;;  %v3263_v62 = vpop.f32.mrb[39].mxu1 }
 0x1dd   : > { %v1453_v63 = vadd.f32 %v3261_v57, %v3149_v54  ;;  %v3264_v0 = vadd.f32 %v3263_v62, %v3262_v58 }
 0x1df   : > { %v1525_v2 = vadd.f32 %v1453_v63, %v595_v60  ;;  %v1456_v3 = vadd.f32 %v3264_v0, %v3152_v61 }
 0x1e0   : > { %v3153_v4 = vpop.f32.mrb[40].mxu0 }
 0x1e1   : > { %1557 = vst [vmem:[#allocation2 + $0x120] sm:$0xff] %v1525_v2  ;;  %v1526_v5 = vadd.f32 %v1456_v3, %v596_v1  ;;  %v3265_v6 = vpop.f32.mrb[40].mxu1  ;;  %v3154_v7 = vpop.f32.mrb[41].mxu0 }
 0x1e2   : > { %v3155_v8 = vadd.f32 %v3154_v7, %v3153_v4  ;;  %v3266_v9 = vpop.f32.mrb[41].mxu1  ;;  %v3156_v10 = vpop.f32.mrb[42].mxu0  ;;  %v603_v4 = vld [vmem:[#allocation2 + $0x1a0] sm:$0xff] }
 0x1e3   : > { %1558 = vst [vmem:[#allocation2 + $0x130] sm:$0xff] %v1526_v5  ;;  %v3267_v11 = vadd.f32 %v3266_v9, %v3265_v6  ;;  %v3268_v12 = vpop.f32.mrb[42].mxu1  ;;  %v3157_v13 = vpop.f32.mrb[43].mxu0  ;;  %v604_v9 = vld [vmem:[#allocation2 + $0x1b0] sm:$0xff] }
 0x1e4   : > { %v3158_v15 = vadd.f32 %v3157_v13, %v3156_v10  ;;  %v3269_v16 = vpop.f32.mrb[43].mxu1 }
 0x1e5   : > { %v1461_v17 = vadd.f32 %v3267_v11, %v3155_v8  ;;  %v3270_v18 = vadd.f32 %v3269_v16, %v3268_v12 }
 0x1e7   : > { %v1527_v20 = vadd.f32 %v1461_v17, %v597_v14  ;;  %v1464_v21 = vadd.f32 %v3270_v18, %v3158_v15 }
 0x1e8   : > { %v3159_v22 = vpop.f32.mrb[44].mxu0 }
 0x1e9   : > { %1559 = vst [vmem:[#allocation2 + $0x140] sm:$0xff] %v1527_v20  ;;  %v1528_v23 = vadd.f32 %v1464_v21, %v598_v19  ;;  %v3271_v24 = vpop.f32.mrb[44].mxu1  ;;  %v3160_v25 = vpop.f32.mrb[45].mxu0 }
 0x1ea   : > { %v3161_v26 = vadd.f32 %v3160_v25, %v3159_v22  ;;  %v3272_v27 = vpop.f32.mrb[45].mxu1  ;;  %v3162_v28 = vpop.f32.mrb[46].mxu0  ;;  %v605_v22 = vld [vmem:[#allocation2 + $0x1c0] sm:$0xff] }
 0x1eb   : > { %1560 = vst [vmem:[#allocation2 + $0x150] sm:$0xff] %v1528_v23  ;;  %v3273_v29 = vadd.f32 %v3272_v27, %v3271_v24  ;;  %v3274_v30 = vpop.f32.mrb[46].mxu1  ;;  %v3163_v31 = vpop.f32.mrb[47].mxu0  ;;  %v606_v27 = vld [vmem:[#allocation2 + $0x1d0] sm:$0xff] }
 0x1ec   : > { %v3164_v33 = vadd.f32 %v3163_v31, %v3162_v28  ;;  %v3275_v34 = vpop.f32.mrb[47].mxu1 }
 0x1ed   : > { %v1469_v35 = vadd.f32 %v3273_v29, %v3161_v26  ;;  %v3276_v36 = vadd.f32 %v3275_v34, %v3274_v30 }
 0x1ef   : > { %v1529_v38 = vadd.f32 %v1469_v35, %v599_v32  ;;  %v1472_v39 = vadd.f32 %v3276_v36, %v3164_v33 }
 0x1f0   : > { %v3165_v40 = vpop.f32.mrb[48].mxu0 }
 0x1f1   : > { %1561 = vst [vmem:[#allocation2 + $0x160] sm:$0xff] %v1529_v38  ;;  %v1530_v41 = vadd.f32 %v1472_v39, %v600_v37  ;;  %v3277_v42 = vpop.f32.mrb[48].mxu1  ;;  %v3166_v43 = vpop.f32.mrb[49].mxu0 }
 0x1f2   : > { %v3167_v44 = vadd.f32 %v3166_v43, %v3165_v40  ;;  %v3278_v45 = vpop.f32.mrb[49].mxu1  ;;  %v3168_v46 = vpop.f32.mrb[50].mxu0  ;;  %v607_v40 = vld [vmem:[#allocation2 + $0x1e0] sm:$0xff] }
 0x1f3   : > { %1562 = vst [vmem:[#allocation2 + $0x170] sm:$0xff] %v1530_v41  ;;  %v3279_v47 = vadd.f32 %v3278_v45, %v3277_v42  ;;  %v3280_v48 = vpop.f32.mrb[50].mxu1  ;;  %v3169_v49 = vpop.f32.mrb[51].mxu0  ;;  %v608_v45 = vld [vmem:[#allocation2 + $0x1f0] sm:$0xff] }
 0x1f4   : > { %v3170_v51 = vadd.f32 %v3169_v49, %v3168_v46  ;;  %v3281_v52 = vpop.f32.mrb[51].mxu1 }
 0x1f5   : > { %v1477_v53 = vadd.f32 %v3279_v47, %v3167_v44  ;;  %v3282_v54 = vadd.f32 %v3281_v52, %v3280_v48 }
 0x1f7   : > { %v1531_v56 = vadd.f32 %v1477_v53, %v601_v50  ;;  %v1480_v57 = vadd.f32 %v3282_v54, %v3170_v51 }
 0x1f8   : > { %v3171_v58 = vpop.f32.mrb[52].mxu0 }
 0x1f9   : > { %1563 = vst [vmem:[#allocation2 + $0x180] sm:$0xff] %v1531_v56  ;;  %v1532_v59 = vadd.f32 %v1480_v57, %v602_v55  ;;  %v3283_v60 = vpop.f32.mrb[52].mxu1  ;;  %v3172_v61 = vpop.f32.mrb[53].mxu0 }
 0x1fa   : > { %v3173_v62 = vadd.f32 %v3172_v61, %v3171_v58  ;;  %v3284_v63 = vpop.f32.mrb[53].mxu1  ;;  %v3174_v0 = vpop.f32.mrb[54].mxu0 }
 0x1fb   : > { %1564 = vst [vmem:[#allocation2 + $0x190] sm:$0xff] %v1532_v59  ;;  %v3285_v1 = vadd.f32 %v3284_v63, %v3283_v60  ;;  %v3286_v2 = vpop.f32.mrb[54].mxu1  ;;  %v3175_v3 = vpop.f32.mrb[55].mxu0 }
 0x1fc   : > { %v3176_v5 = vadd.f32 %v3175_v3, %v3174_v0  ;;  %v3287_v6 = vpop.f32.mrb[55].mxu1 }
 0x1fd   : > { %v1485_v7 = vadd.f32 %v3285_v1, %v3173_v62  ;;  %v3288_v8 = vadd.f32 %v3287_v6, %v3286_v2 }
 0x1ff   : > { %v1533_v10 = vadd.f32 %v1485_v7, %v603_v4  ;;  %v1488_v11 = vadd.f32 %v3288_v8, %v3176_v5 }
 0x200   : > { %v3177_v12 = vpop.f32.mrb[56].mxu0 }
 0x201   : > { %1565 = vst [vmem:[#allocation2 + $0x1a0] sm:$0xff] %v1533_v10  ;;  %v1534_v13 = vadd.f32 %v1488_v11, %v604_v9  ;;  %v3289_v14 = vpop.f32.mrb[56].mxu1  ;;  %v3178_v15 = vpop.f32.mrb[57].mxu0 }
 0x202   : > { %v3179_v16 = vadd.f32 %v3178_v15, %v3177_v12  ;;  %v3290_v17 = vpop.f32.mrb[57].mxu1  ;;  %v3180_v18 = vpop.f32.mrb[58].mxu0 }
 0x203   : > { %1566 = vst [vmem:[#allocation2 + $0x1b0] sm:$0xff] %v1534_v13  ;;  %v3291_v19 = vadd.f32 %v3290_v17, %v3289_v14  ;;  %v3292_v20 = vpop.f32.mrb[58].mxu1  ;;  %v3181_v21 = vpop.f32.mrb[59].mxu0 }
 0x204   : > { %v3182_v23 = vadd.f32 %v3181_v21, %v3180_v18  ;;  %v3293_v24 = vpop.f32.mrb[59].mxu1 }
 0x205   : > { %v1493_v25 = vadd.f32 %v3291_v19, %v3179_v16  ;;  %v3294_v26 = vadd.f32 %v3293_v24, %v3292_v20 }
 0x207   : > { %v1535_v28 = vadd.f32 %v1493_v25, %v605_v22  ;;  %v1496_v29 = vadd.f32 %v3294_v26, %v3182_v23 }
 0x208   : > { %v3183_v30 = vpop.f32.mrb[60].mxu0 }
 0x209   : > { %1567 = vst [vmem:[#allocation2 + $0x1c0] sm:$0xff] %v1535_v28  ;;  %v1536_v31 = vadd.f32 %v1496_v29, %v606_v27  ;;  %v3295_v32 = vpop.f32.mrb[60].mxu1  ;;  %v3184_v33 = vpop.f32.mrb[61].mxu0 }
 0x20a   : > { %v3185_v34 = vadd.f32 %v3184_v33, %v3183_v30  ;;  %v3296_v35 = vpop.f32.mrb[61].mxu1  ;;  %v3186_v36 = vpop.f32.mrb[62].mxu0 }
 0x20b   : > { %1568 = vst [vmem:[#allocation2 + $0x1d0] sm:$0xff] %v1536_v31  ;;  %v3297_v37 = vadd.f32 %v3296_v35, %v3295_v32  ;;  %v3298_v38 = vpop.f32.mrb[62].mxu1  ;;  %v3187_v39 = vpop.f32.mrb[63].mxu0 }
 0x20c   : > { %v3188_v41 = vadd.f32 %v3187_v39, %v3186_v36  ;;  %v3299_v42 = vpop.f32.mrb[63].mxu1 }
 0x20d   : > { %v1501_v43 = vadd.f32 %v3297_v37, %v3185_v34  ;;  %v3300_v44 = vadd.f32 %v3299_v42, %v3298_v38 }
 0x20f   : > { %v1537_v46 = vadd.f32 %v1501_v43, %v607_v40  ;;  %v1504_v47 = vadd.f32 %v3300_v44, %v3188_v41 }
 0x211   : > { %1569 = vst [vmem:[#allocation2 + $0x1e0] sm:$0xff] %v1537_v46  ;;  %v1538_v48 = vadd.f32 %v1504_v47, %v608_v45 }
 0x213   : > { %1570 = vst [vmem:[#allocation2 + $0x1f0] sm:$0xff] %v1538_v48 }
 0x214 PF: > { %v1622_v49 = vld [vmem:[%s4086_s23 + $0x80] sm:$0xff]  ;;  %v3827_v51 = vmov 0   ;;  %v1623_v52 = vld [vmem:[%s4086_s23 + $0x88] sm:$0xff]  ;;  %v1609_v54 = vld [vmem:[%s4086_s23 + $0x18] sm:$0xff]  ;;  %s2997_s15 = sshll.u32 %s3808_s19, 12  ;;  %s2658_s28 = sshll.u32 %s4105_s29, 4  ;;  %s4406_s28 = int_to_ptr.vmem [resolvable:$true] %s2658_s28 }
 0x215   : > { %v1606_v50 = vld [vmem:[%s4086_s23] sm:$0xff]  ;;  %3573 = vset.pattern.permute.xlu1 %v3827_v51  ;;  %3572 = vset.pattern.permute.xlu0 %v3827_v51  ;;  %v1607_v53 = vld [vmem:[%s4086_s23 + $0x8] sm:$0xff]  ;;  %v1608_v55 = vld [vmem:[%s4086_s23 + $0x10] sm:$0xff]  ;;  %s4511_s12 = sld [smem:[#allocation25_spill]]  ;;  %s4414_s19 = scalar_lea.sflag [#allocation8], %s349_s21 }
 0x216   : > { %1720 = vperm.xlu1 %3573, %v1622_v49   ;;  %1640 = vperm.xlu0 %3572, %v1606_v50   ;;  %v1625_v56 = vld [vmem:[%s4086_s23 + $0x98] sm:$0xff]  ;;  %v1624_v57 = vld [vmem:[%s4086_s23 + $0x90] sm:$0xff]  ;;  %v3574_v58 = vld [vmem:[#allocation9 + $0x4] ss:$8 sps:$4 sm:$0xff]   ;;  %s3704_s9 = scalar_lea.vmem %s4406_s28, 4096  ;;  %p4512_p5 = scmp.ne.s32.totalorder %s4498_s26, 0 }
 0x217   : > { %v3576_v59 = vld [vmem:[#allocation9] ss:$8 sps:$4 sm:$0xff]   ;;  %v3577_v60 = vld [vmem:[#allocation9 + $0x14] ss:$8 sps:$4 sm:$0xff]   ;;  %2162 = vmatprep.subr.bf16.mxu0 %v3574_v58  ;;  %3301 = vmatprep.subr.bf16.mxu1 %v3574_v58  ;;  %v3579_v63 = vld [vmem:[#allocation9 + $0x10] ss:$8 sps:$4 sm:$0xff]   ;;  %p3705_p3 = scmp.ne.s32.totalorder %s4406_s28, %s3704_s9 }
 0x218   : > { %v1611_v61 = vld [vmem:[%s4086_s23 + $0x28] sm:$0xff]  ;;  %v1610_v62 = vld [vmem:[%s4086_s23 + $0x20] sm:$0xff]  ;;  %2163 = vmatpush1.bf16.msra.mxu0 %v3576_v59  ;;  %3317 = vmatpush1.bf16.msra.mxu1 %v3576_v59  ;;  %v3583_v4 = vld [vmem:[#allocation9 + $0x34] ss:$8 sps:$4 sm:$0xff]   ;;  %s3828_s30 = smov [#allocation11]  }
 0x219   : > { %2164 = vmatprep.subr.bf16.mxu0 %v3577_v60  ;;  %3302 = vmatprep.subr.bf16.mxu1 %v3577_v60  ;;  %v3580_v0 = vld [vmem:[#allocation9 + $0x24] ss:$8 sps:$4 sm:$0xff]   ;;  %v3582_v3 = vld [vmem:[#allocation9 + $0x20] ss:$8 sps:$4 sm:$0xff]   ;;  %v1613_v5 = vld [vmem:[%s4086_s23 + $0x38] sm:$0xff]  ;;  %p3706_p7 = pnand %p3705_p3, %p4512_p5  ;;  %s3708_s22 = sshll.u32 %s3828_s30, 4  ;;  %s3709_s22 = int_to_ptr.vmem [resolvable:$false] %s3708_s22 }
 0x21a   : > { %1725 = vperm.xlu1 %3573, %v1623_v52   ;;  %1645 = vperm.xlu0 %3572, %v1607_v53   ;;  %v1627_v1 = vld [vmem:[%s4086_s23 + $0xa8] sm:$0xff]  ;;  %v1626_v2 = vld [vmem:[%s4086_s23 + $0xa0] sm:$0xff]  ;;  %v1612_v6 = vld [vmem:[%s4086_s23 + $0x30] sm:$0xff]  ;;  %s3710_s11 = scalar_lea.vmem %s3709_s22, 8192  ;;  %p3711_p12 = scmp.lt.s32.totalorder %s4406_s28, %s3709_s22 }
 0x21b   : > { %v3585_v7 = vld [vmem:[#allocation9 + $0x30] ss:$8 sps:$4 sm:$0xff]   ;;  %v3586_v8 = vld [vmem:[#allocation9 + $0x44] ss:$8 sps:$4 sm:$0xff]   ;;  %v3588_v11 = vld [vmem:[#allocation9 + $0x40] ss:$8 sps:$4 sm:$0xff]   ;;  %s4404_s25 = scalar_lea.hbm %s4511_s12, %s2997_s15  ;;  %p3707_p9 = pneg %p3706_p7 }
 0x21c   : > { %2165 = vmatpush1.bf16.msra.mxu0 %v3579_v63  ;;  %3318 = vmatpush1.bf16.msra.mxu1 %v3579_v63  ;;  %v1629_v9 = vld [vmem:[%s4086_s23 + $0xb8] sm:$0xff]  ;;  %v1628_v10 = vld [vmem:[%s4086_s23 + $0xb0] sm:$0xff]  ;;  %v1615_v13 = vld [vmem:[%s4086_s23 + $0x48] sm:$0xff]  ;;  %p3712_p0 = scmp.lt.s32.totalorder %s3710_s11, %s3704_s9 }
 0x21d   : > { %2166 = vmatprep.subr.bf16.mxu0 %v3580_v0  ;;  %3303 = vmatprep.subr.bf16.mxu1 %v3580_v0  ;;  %v3589_v12 = vld [vmem:[#allocation9 + $0x54] ss:$8 sps:$4 sm:$0xff]   ;;  %v1614_v14 = vld [vmem:[%s4086_s23 + $0x40] sm:$0xff]  ;;  %v3591_v15 = vld [vmem:[#allocation9 + $0x50] ss:$8 sps:$4 sm:$0xff]  }
 0x21e   : > { %1655 = vperm.xlu1 %3573, %v1609_v54   ;;  %1650 = vperm.xlu0 %3572, %v1608_v55   ;;  %v3592_v16 = vld [vmem:[#allocation9 + $0x64] ss:$8 sps:$4 sm:$0xff]   ;;  %v3594_v19 = vld [vmem:[#allocation9 + $0x60] ss:$8 sps:$4 sm:$0xff]   ;;  %v1865_v21 = vld [vmem:[#allocation2 + $0x18] sm:$0xff]  ;;  %p3713_p2 = por %p3712_p0, %p3711_p12 }
 0x21f   : > { %v1631_v17 = vld [vmem:[%s4086_s23 + $0xc8] sm:$0xff]  ;;  %v1630_v18 = vld [vmem:[%s4086_s23 + $0xc0] sm:$0xff]  ;;  %v1897_v23 = vld [vmem:[#allocation2 + $0x118] sm:$0xff] }
 0x220   : > { %2167 = vmatpush1.bf16.msra.mxu0 %v3582_v3  ;;  %3319 = vmatpush1.bf16.msra.mxu1 %v3582_v3  ;;  %v1863_v20 = vld [vmem:[#allocation2 + $0x8] sm:$0xff]  ;;  %v3595_v24 = vld [vmem:[#allocation9 + $0x74] ss:$8 sps:$4 sm:$0xff]   ;;  %v3597_v29 = vld [vmem:[#allocation9 + $0x70] ss:$8 sps:$4 sm:$0xff]   ;;  %p3714_p6 = pnand %p3713_p2, %p3707_p9 }
 0x221   : > { %2168 = vmatprep.subr.bf16.mxu0 %v3583_v4  ;;  %3304 = vmatprep.subr.bf16.mxu1 %v3583_v4  ;;  %v1895_v22 = vld [vmem:[#allocation2 + $0x108] sm:$0xff]  ;;  %v1927_v25 = vpack.c.bf16 %v1865_v21, %v1863_v20  ;;  %v1617_v27 = vld [vmem:[%s4086_s23 + $0x58] sm:$0xff]  ;;  %v1616_v28 = vld [vmem:[%s4086_s23 + $0x50] sm:$0xff] }
 0x222   : > { %1735 = vperm.xlu1 %3573, %v1625_v56   ;;  %1730 = vperm.xlu0 %3572, %v1624_v57   ;;  %v1943_v26 = vpack.c.bf16 %v1897_v23, %v1895_v22  ;;  %v3598_v30 = vld [vmem:[#allocation9 + $0x84] ss:$8 sps:$4 sm:$0xff]   ;;  %v1633_v31 = vld [vmem:[%s4086_s23 + $0xd8] sm:$0xff]  ;;  %v1632_v32 = vld [vmem:[%s4086_s23 + $0xd0] sm:$0xff] }
 0x223   : > { %2194 = vmatprep.mubr.bf16.mxu0 %v1927_v25  ;;  %v3600_v33 = vld [vmem:[#allocation9 + $0x80] ss:$8 sps:$4 sm:$0xff]   ;;  %v3601_v34 = vld [vmem:[#allocation9 + $0x94] ss:$8 sps:$4 sm:$0xff]   ;;  %v3603_v37 = vld [vmem:[#allocation9 + $0x90] ss:$8 sps:$4 sm:$0xff]  }
 0x224   : > { %2169 = vmatpush1.bf16.msra.mxu0 %v3585_v7  ;;  %3320 = vmatpush1.bf16.msra.mxu1 %v3585_v7  ;;  %v1619_v35 = vld [vmem:[%s4086_s23 + $0x68] sm:$0xff]  ;;  %v1618_v36 = vld [vmem:[%s4086_s23 + $0x60] sm:$0xff]  ;;  %v3607_v42 = vld [vmem:[#allocation9 + $0xb4] ss:$8 sps:$4 sm:$0xff]  }
 0x225   : > { %2170 = vmatprep.subr.bf16.mxu0 %v3586_v8  ;;  %3305 = vmatprep.subr.bf16.mxu1 %v3586_v8  ;;  %v3604_v38 = vld [vmem:[#allocation9 + $0xa4] ss:$8 sps:$4 sm:$0xff]   ;;  %v3606_v41 = vld [vmem:[#allocation9 + $0xa0] ss:$8 sps:$4 sm:$0xff]   ;;  %v1621_v43 = vld [vmem:[%s4086_s23 + $0x78] sm:$0xff] }
 0x226   : > { %1665 = vperm.xlu1 %3573, %v1611_v61   ;;  %1660 = vperm.xlu0 %3572, %v1610_v62   ;;  %v1635_v39 = vld [vmem:[%s4086_s23 + $0xe8] sm:$0xff]  ;;  %v1634_v40 = vld [vmem:[%s4086_s23 + $0xe0] sm:$0xff]  ;;  %v1620_v44 = vld [vmem:[%s4086_s23 + $0x70] sm:$0xff] }
 0x227   : > { %2274 = vmatprep.mubr.bf16.mxu1 %v1943_v26  ;;  %v3609_v45 = vld [vmem:[#allocation9 + $0xb0] ss:$8 sps:$4 sm:$0xff]   ;;  %v3610_v46 = vld [vmem:[#allocation9 + $0xc4] ss:$8 sps:$4 sm:$0xff]   ;;  %v3612_v49 = vld [vmem:[#allocation9 + $0xc0] ss:$8 sps:$4 sm:$0xff]  }
 0x228   : > { %2171 = vmatpush1.bf16.msra.mxu0 %v3588_v11  ;;  %3321 = vmatpush1.bf16.msra.mxu1 %v3588_v11  ;;  %v1637_v47 = vld [vmem:[%s4086_s23 + $0xf8] sm:$0xff]  ;;  %v1636_v48 = vld [vmem:[%s4086_s23 + $0xf0] sm:$0xff]  ;;  %v3616_v52 = vld [vmem:[#allocation9 + $0xe4] ss:$8 sps:$4 sm:$0xff]  }
 0x229   : > { %2172 = vmatprep.subr.bf16.mxu0 %v3589_v12  ;;  %3306 = vmatprep.subr.bf16.mxu1 %v3589_v12  ;;  %v3613_v50 = vld [vmem:[#allocation9 + $0xd4] ss:$8 sps:$4 sm:$0xff]   ;;  %v3615_v51 = vld [vmem:[#allocation9 + $0xd0] ss:$8 sps:$4 sm:$0xff]   ;;  %v3618_v53 = vld [vmem:[#allocation9 + $0xe0] ss:$8 sps:$4 sm:$0xff]  }
 0x22a   : > { %1745 = vperm.xlu1 %3573, %v1627_v1   ;;  %1740 = vperm.xlu0 %3572, %v1626_v2   ;;  %v3619_v54 = vld [vmem:[#allocation9 + $0xf4] ss:$8 sps:$4 sm:$0xff]   ;;  %v3621_v55 = vld [vmem:[#allocation9 + $0xf0] ss:$8 sps:$4 sm:$0xff]   ;;  %v1590_v56 = vld [vmem:[#allocation2 + $0x100] sm:$0xff] }
 0x22b   : > { %v1574_v57 = vld [vmem:[#allocation2] sm:$0xff]  ;;  %v1591_v62 = vld [vmem:[#allocation2 + $0x110] sm:$0xff]  ;;  %v1867_v0 = vld [vmem:[#allocation2 + $0x28] sm:$0xff] }
 0x22c   : > { %2173 = vmatpush1.bf16.msra.mxu0 %v3591_v15  ;;  %3322 = vmatpush1.bf16.msra.mxu1 %v3591_v15  ;;  %v1575_v63 = vld [vmem:[#allocation2 + $0x10] sm:$0xff]  ;;  %v1869_v1 = vld [vmem:[#allocation2 + $0x38] sm:$0xff]  ;;  %v1899_v2 = vld [vmem:[#allocation2 + $0x128] sm:$0xff] }
 0x22d   : > { %2174 = vmatprep.subr.bf16.mxu0 %v3592_v16  ;;  %3307 = vmatprep.subr.bf16.mxu1 %v3592_v16  ;;  %v1901_v3 = vld [vmem:[#allocation2 + $0x138] sm:$0xff]  ;;  %v1577_v8 = vld [vmem:[#allocation2 + $0x30] sm:$0xff]  ;;  %v1871_v20 = vld [vmem:[#allocation2 + $0x48] sm:$0xff] }
 0x22e   : > { %1675 = vperm.xlu1 %3573, %v1613_v5   ;;  %1670 = vperm.xlu0 %3572, %v1612_v6   ;;  %v1945_v11 = vpack.c.bf16 %v1901_v3, %v1899_v2  ;;  %v1873_v21 = vld [vmem:[#allocation2 + $0x58] sm:$0xff]  ;;  %v1903_v22 = vld [vmem:[#allocation2 + $0x148] sm:$0xff] }
 0x22f   : > { %v1905_v23 = vld [vmem:[#allocation2 + $0x158] sm:$0xff] }
 0x230   : > { %2175 = vmatpush1.bf16.msra.mxu0 %v3594_v19  ;;  %3323 = vmatpush1.bf16.msra.mxu1 %v3594_v19  ;;  %v1592_v19 = vld [vmem:[#allocation2 + $0x120] sm:$0xff] }
 0x231   : > { %2176 = vmatprep.subr.bf16.mxu0 %v3595_v24  ;;  %3308 = vmatprep.subr.bf16.mxu1 %v3595_v24 }
 0x232   : > { %1755 = vperm.xlu1 %3573, %v1629_v9   ;;  %1750 = vperm.xlu0 %3572, %v1628_v10   ;;  %v1576_v9 = vld [vmem:[#allocation2 + $0x20] sm:$0xff]  ;;  %v1929_v10 = vpack.c.bf16 %v1869_v1, %v1867_v0 }
 0x234   : > { %2177 = vmatpush1.bf16.msra.mxu0 %v3597_v29  ;;  %3324 = vmatpush1.bf16.msra.mxu1 %v3597_v29  ;;  %v1578_v29 = vld [vmem:[#allocation2 + $0x40] sm:$0xff] }
 0x235   : > { %2178 = vmatprep.subr.bf16.mxu0 %v3598_v30  ;;  %3309 = vmatprep.subr.bf16.mxu1 %v3598_v30  ;;  %v1931_v30 = vpack.c.bf16 %v1873_v21, %v1871_v20 }
 0x236   : > { %1685 = vperm.xlu1 %3573, %v1615_v13   ;;  %1680 = vperm.xlu0 %3572, %v1614_v14  }
 0x238   : > { %2179 = vmatpush1.bf16.msra.mxu0 %v3600_v33  ;;  %3325 = vmatpush1.bf16.msra.mxu1 %v3600_v33 }
 0x239   : > { %2180 = vmatprep.subr.bf16.mxu0 %v3601_v34  ;;  %3310 = vmatprep.subr.bf16.mxu1 %v3601_v34 }
 0x23a   : > { %1765 = vperm.xlu1 %3573, %v1631_v17   ;;  %1760 = vperm.xlu0 %3572, %v1630_v18   ;;  %v1593_v18 = vld [vmem:[#allocation2 + $0x130] sm:$0xff] }
 0x23c   : > { %2181 = vmatpush1.bf16.msra.mxu0 %v3603_v37  ;;  %3326 = vmatpush1.bf16.msra.mxu1 %v3603_v37 }
 0x23d   : > { %2182 = vmatprep.subr.bf16.mxu0 %v3604_v38  ;;  %3311 = vmatprep.subr.bf16.mxu1 %v3604_v38  ;;  %v1595_v38 = vld [vmem:[#allocation2 + $0x150] sm:$0xff] }
 0x23e   : > { %1695 = vperm.xlu1 %3573, %v1617_v27   ;;  %1690 = vperm.xlu0 %3572, %v1616_v28   ;;  %v1579_v28 = vld [vmem:[#allocation2 + $0x50] sm:$0xff] }
 0x240   : > { %2183 = vmatpush1.bf16.msra.mxu0 %v3606_v41  ;;  %3327 = vmatpush1.bf16.msra.mxu1 %v3606_v41  ;;  %v1877_v41 = vld [vmem:[#allocation2 + $0x78] sm:$0xff] }
 0x241   : > { %2184 = vmatprep.subr.bf16.mxu0 %v3607_v42  ;;  %3312 = vmatprep.subr.bf16.mxu1 %v3607_v42  ;;  %v1907_v42 = vld [vmem:[#allocation2 + $0x168] sm:$0xff] }
 0x242   : > { %1775 = vperm.xlu1 %3573, %v1633_v31   ;;  %1770 = vperm.xlu0 %3572, %v1632_v32   ;;  %v1947_v31 = vpack.c.bf16 %v1905_v23, %v1903_v22 }
 0x244   : > { %2185 = vmatpush1.bf16.msra.mxu0 %v3609_v45  ;;  %3328 = vmatpush1.bf16.msra.mxu1 %v3609_v45 }
 0x245   : > { %2186 = vmatprep.subr.bf16.mxu0 %v3610_v46  ;;  %3313 = vmatprep.subr.bf16.mxu1 %v3610_v46 }
 0x246   : > { %1705 = vperm.xlu1 %3573, %v1619_v35   ;;  %1700 = vperm.xlu0 %3572, %v1618_v36  }
 0x248   : > { %2187 = vmatpush1.bf16.msra.mxu0 %v3612_v49  ;;  %3329 = vmatpush1.bf16.msra.mxu1 %v3612_v49  ;;  %v1580_v49 = vld [vmem:[#allocation2 + $0x60] sm:$0xff] }
 0x249   : > { %2188 = vmatprep.subr.bf16.mxu0 %v3613_v50  ;;  %3314 = vmatprep.subr.bf16.mxu1 %v3613_v50 }
 0x24a   : > { %1785 = vperm.xlu1 %3573, %v1635_v39   ;;  %1780 = vperm.xlu0 %3572, %v1634_v40   ;;  %v1594_v39 = vld [vmem:[#allocation2 + $0x140] sm:$0xff]  ;;  %v1875_v40 = vld [vmem:[#allocation2 + $0x68] sm:$0xff] }
 0x24b   : > { %v1933_v50 = vpack.c.bf16 %v1877_v41, %v1875_v40 }
 0x24c   : > { %2189 = vmatpush1.bf16.msra.mxu0 %v3615_v51  ;;  %3330 = vmatpush1.bf16.msra.mxu1 %v3615_v51 }
 0x24d   : > { %2190 = vmatprep.subr.bf16.mxu0 %v3616_v52  ;;  %3315 = vmatprep.subr.bf16.mxu1 %v3616_v52 }
 0x24e   : > { %1715 = vperm.xlu1 %3573, %v1621_v43   ;;  %1710 = vperm.xlu0 %3572, %v1620_v44   ;;  %v1909_v43 = vld [vmem:[#allocation2 + $0x178] sm:$0xff] }
 0x24f   : > { %v1949_v51 = vpack.c.bf16 %v1909_v43, %v1907_v42 }
 0x250   : > { %2191 = vmatpush1.bf16.msra.mxu0 %v3618_v53  ;;  %3331 = vmatpush1.bf16.msra.mxu1 %v3618_v53 }
 0x251   : > { %2192 = vmatprep.subr.bf16.mxu0 %v3619_v54  ;;  %3316 = vmatprep.subr.bf16.mxu1 %v3619_v54 }
 0x252   : > { %1795 = vperm.xlu1 %3573, %v1637_v47   ;;  %1790 = vperm.xlu0 %3572, %v1636_v48   ;;  %v1581_v48 = vld [vmem:[#allocation2 + $0x70] sm:$0xff] }
 0x254   : > { %2193 = vmatpush1.bf16.msra.mxu0 %v3621_v55  ;;  %3332 = vmatpush1.bf16.msra.mxu1 %v3621_v55 }
 0x295   : > { %v1721_v58 = vpop.permute.xlu1 %1720  ;;  %v1641_v59 = vpop.permute.xlu0 %1640 }
 0x296   : > { %v1814_v60 = vmul.f32 %v1721_v58, %v1590_v56  ;;  %v1798_v61 = vmul.f32 %v1641_v59, %v1574_v57  ;;  %v1597_v58 = vld [vmem:[#allocation2 + $0x170] sm:$0xff]  ;;  %v1596_v59 = vld [vmem:[#allocation2 + $0x160] sm:$0xff] }
 0x298   : > { %1846 = vst [vmem:[#allocation2 + $0x100] sm:$0xff] %v1814_v60  ;;  %1830 = vst [vmem:[#allocation2] sm:$0xff] %v1798_v61 }
 0x299   : > { %v1726_v4 = vpop.permute.xlu1 %1725  ;;  %v1646_v5 = vpop.permute.xlu0 %1645 }
 0x29a   : > { %v1815_v6 = vmul.f32 %v1726_v4, %v1591_v62  ;;  %v1799_v7 = vmul.f32 %v1646_v5, %v1575_v63  ;;  %v1911_v62 = vld [vmem:[#allocation2 + $0x188] sm:$0xff]  ;;  %v1913_v63 = vld [vmem:[#allocation2 + $0x198] sm:$0xff]  ;;  %v1583_v4 = vld [vmem:[#allocation2 + $0x90] sm:$0xff] }
 0x29b   : > { %v1582_v5 = vld [vmem:[#allocation2 + $0x80] sm:$0xff] }
 0x29c   : > { %1847 = vst [vmem:[#allocation2 + $0x110] sm:$0xff] %v1815_v6  ;;  %1831 = vst [vmem:[#allocation2 + $0x10] sm:$0xff] %v1799_v7  ;;  %v1926_v12 = vpack.c.bf16 %v1799_v7, %v1798_v61  ;;  %v1942_v13 = vpack.c.bf16 %v1815_v6, %v1814_v60  ;;  %v1879_v60 = vld [vmem:[#allocation2 + $0x88] sm:$0xff]  ;;  %v1881_v61 = vld [vmem:[#allocation2 + $0x98] sm:$0xff]  ;;  %v1951_v7 = vpack.c.bf16 %v1913_v63, %v1911_v62 }
 0x29d   : > { %v1656_v14 = vpop.permute.xlu1 %1655  ;;  %v1651_v15 = vpop.permute.xlu0 %1650  ;;  %v1935_v6 = vpack.c.bf16 %v1881_v61, %v1879_v60 }
 0x29e   : > { %v1801_v16 = vmul.f32 %v1656_v14, %v1577_v8  ;;  %v1800_v17 = vmul.f32 %v1651_v15, %v1576_v9  ;;  %2195 = vmatmul.mubr.bf16.vlgmr.msra.gmra.mrb[0].mxu0 %v1926_v12  ;;  %2275 = vmatmul.mubr.bf16.vlgmr.msra.gmra.mrb[0].mxu1 %v1942_v13  ;;  %v1599_v14 = vld [vmem:[#allocation2 + $0x190] sm:$0xff]  ;;  %v1598_v15 = vld [vmem:[#allocation2 + $0x180] sm:$0xff] }
 0x29f   : > { %2204 = vmatprep.mubr.bf16.mxu0 %v1929_v10  ;;  %2284 = vmatprep.mubr.bf16.mxu1 %v1945_v11 }
 0x2a0   : > { %1833 = vst [vmem:[#allocation2 + $0x30] sm:$0xff] %v1801_v16  ;;  %1832 = vst [vmem:[#allocation2 + $0x20] sm:$0xff] %v1800_v17  ;;  %v1928_v32 = vpack.c.bf16 %v1801_v16, %v1800_v17  ;;  %v1883_v16 = vld [vmem:[#allocation2 + $0xa8] sm:$0xff]  ;;  %v1885_v17 = vld [vmem:[#allocation2 + $0xb8] sm:$0xff] }
 0x2a1   : > { %v1736_v24 = vpop.permute.xlu1 %1735  ;;  %v1731_v25 = vpop.permute.xlu0 %1730 }
 0x2a2   : > { %v1817_v26 = vmul.f32 %v1736_v24, %v1593_v18  ;;  %v1816_v27 = vmul.f32 %v1731_v25, %v1592_v19  ;;  %v1915_v18 = vld [vmem:[#allocation2 + $0x1a8] sm:$0xff]  ;;  %v1917_v19 = vld [vmem:[#allocation2 + $0x1b8] sm:$0xff]  ;;  %v1585_v24 = vld [vmem:[#allocation2 + $0xb0] sm:$0xff] }
 0x2a3   : > { %v1584_v25 = vld [vmem:[#allocation2 + $0xa0] sm:$0xff] }
 0x2a4   : > { %1849 = vst [vmem:[#allocation2 + $0x130] sm:$0xff] %v1817_v26  ;;  %1848 = vst [vmem:[#allocation2 + $0x120] sm:$0xff] %v1816_v27  ;;  %v1944_v33 = vpack.c.bf16 %v1817_v26, %v1816_v27  ;;  %v1937_v26 = vpack.c.bf16 %v1885_v17, %v1883_v16  ;;  %v1953_v27 = vpack.c.bf16 %v1917_v19, %v1915_v18  ;;  %v1992_v18 = vlaneseq }
 0x2a5   : > { %v1666_v34 = vpop.permute.xlu1 %1665  ;;  %v1661_v35 = vpop.permute.xlu0 %1660 }
 0x2a6   : > { %v1803_v36 = vmul.f32 %v1666_v34, %v1579_v28  ;;  %v1802_v37 = vmul.f32 %v1661_v35, %v1578_v29  ;;  %2205 = vmatmul.mubr.bf16.gmra.mrb[4].mxu0 %v1928_v32  ;;  %2285 = vmatmul.mubr.bf16.gmra.mrb[4].mxu1 %v1944_v33  ;;  %v1601_v34 = vld [vmem:[#allocation2 + $0x1b0] sm:$0xff]  ;;  %v1600_v35 = vld [vmem:[#allocation2 + $0x1a0] sm:$0xff]  ;;  %v1993_v19 = vshrl.u32 %v1992_v18, 7 }
 0x2a7   : > { %2214 = vmatprep.mubr.bf16.mxu0 %v1931_v30  ;;  %2294 = vmatprep.mubr.bf16.mxu1 %v1947_v31 }
 0x2a8   : > { %1835 = vst [vmem:[#allocation2 + $0x50] sm:$0xff] %v1803_v36  ;;  %1834 = vst [vmem:[#allocation2 + $0x40] sm:$0xff] %v1802_v37  ;;  %v1930_v52 = vpack.c.bf16 %v1803_v36, %v1802_v37  ;;  %v1887_v36 = vld [vmem:[#allocation2 + $0xc8] sm:$0xff]  ;;  %v1889_v37 = vld [vmem:[#allocation2 + $0xd8] sm:$0xff] }
 0x2a9   : > { %v1746_v44 = vpop.permute.xlu1 %1745  ;;  %v1741_v45 = vpop.permute.xlu0 %1740 }
 0x2aa   : > { %v1819_v46 = vmul.f32 %v1746_v44, %v1595_v38  ;;  %v1818_v47 = vmul.f32 %v1741_v45, %v1594_v39  ;;  %v1919_v38 = vld [vmem:[#allocation2 + $0x1c8] sm:$0xff]  ;;  %v1921_v39 = vld [vmem:[#allocation2 + $0x1d8] sm:$0xff]  ;;  %v1587_v44 = vld [vmem:[#allocation2 + $0xd0] sm:$0xff] }
 0x2ab   : > { %v1586_v45 = vld [vmem:[#allocation2 + $0xc0] sm:$0xff] }
 0x2ac   : > { %1851 = vst [vmem:[#allocation2 + $0x150] sm:$0xff] %v1819_v46  ;;  %1850 = vst [vmem:[#allocation2 + $0x140] sm:$0xff] %v1818_v47  ;;  %v1946_v53 = vpack.c.bf16 %v1819_v46, %v1818_v47  ;;  %v1939_v46 = vpack.c.bf16 %v1889_v37, %v1887_v36  ;;  %v1955_v47 = vpack.c.bf16 %v1921_v39, %v1919_v38 }
 0x2ad   : > { %v1676_v54 = vpop.permute.xlu1 %1675  ;;  %v1671_v55 = vpop.permute.xlu0 %1670 }
 0x2ae   : > { %v1805_v56 = vmul.f32 %v1676_v54, %v1581_v48  ;;  %v1804_v57 = vmul.f32 %v1671_v55, %v1580_v49  ;;  %2215 = vmatmul.mubr.bf16.gmra.mrb[8].mxu0 %v1930_v52  ;;  %2295 = vmatmul.mubr.bf16.gmra.mrb[8].mxu1 %v1946_v53  ;;  %v1603_v54 = vld [vmem:[#allocation2 + $0x1d0] sm:$0xff]  ;;  %v1602_v55 = vld [vmem:[#allocation2 + $0x1c0] sm:$0xff] }
 0x2af   : > { %2224 = vmatprep.mubr.bf16.mxu0 %v1933_v50  ;;  %2304 = vmatprep.mubr.bf16.mxu1 %v1949_v51 }
 0x2b0   : > { %1837 = vst [vmem:[#allocation2 + $0x70] sm:$0xff] %v1805_v56  ;;  %1836 = vst [vmem:[#allocation2 + $0x60] sm:$0xff] %v1804_v57  ;;  %v1932_v8 = vpack.c.bf16 %v1805_v56, %v1804_v57  ;;  %v1891_v56 = vld [vmem:[#allocation2 + $0xe8] sm:$0xff]  ;;  %v1893_v57 = vld [vmem:[#allocation2 + $0xf8] sm:$0xff] }
 0x2b1   : > { %v1756_v0 = vpop.permute.xlu1 %1755  ;;  %v1751_v1 = vpop.permute.xlu0 %1750 }
 0x2b2   : > { %v1821_v2 = vmul.f32 %v1756_v0, %v1597_v58  ;;  %v1820_v3 = vmul.f32 %v1751_v1, %v1596_v59  ;;  %v1923_v58 = vld [vmem:[#allocation2 + $0x1e8] sm:$0xff]  ;;  %v1925_v59 = vld [vmem:[#allocation2 + $0x1f8] sm:$0xff]  ;;  %v1589_v0 = vld [vmem:[#allocation2 + $0xf0] sm:$0xff] }
 0x2b3   : > { %v1588_v1 = vld [vmem:[#allocation2 + $0xe0] sm:$0xff] }
 0x2b4   : > { %1853 = vst [vmem:[#allocation2 + $0x170] sm:$0xff] %v1821_v2  ;;  %1852 = vst [vmem:[#allocation2 + $0x160] sm:$0xff] %v1820_v3  ;;  %v1948_v9 = vpack.c.bf16 %v1821_v2, %v1820_v3  ;;  %v1941_v2 = vpack.c.bf16 %v1893_v57, %v1891_v56  ;;  %v1957_v3 = vpack.c.bf16 %v1925_v59, %v1923_v58 }
 0x2b5   : > { %v1686_v10 = vpop.permute.xlu1 %1685  ;;  %v1681_v11 = vpop.permute.xlu0 %1680 }
 0x2b6   : > { %v1807_v12 = vmul.f32 %v1686_v10, %v1583_v4  ;;  %v1806_v13 = vmul.f32 %v1681_v11, %v1582_v5  ;;  %2225 = vmatmul.mubr.bf16.gmra.mrb[12].mxu0 %v1932_v8  ;;  %2305 = vmatmul.mubr.bf16.gmra.mrb[12].mxu1 %v1948_v9  ;;  %v1605_v10 = vld [vmem:[#allocation2 + $0x1f0] sm:$0xff]  ;;  %v1604_v11 = vld [vmem:[#allocation2 + $0x1e0] sm:$0xff] }
 0x2b7   : > { %2234 = vmatprep.mubr.bf16.mxu0 %v1935_v6  ;;  %2314 = vmatprep.mubr.bf16.mxu1 %v1951_v7 }
 0x2b8   : > { %1839 = vst [vmem:[#allocation2 + $0x90] sm:$0xff] %v1807_v12  ;;  %1838 = vst [vmem:[#allocation2 + $0x80] sm:$0xff] %v1806_v13  ;;  %v1934_v28 = vpack.c.bf16 %v1807_v12, %v1806_v13 }
 0x2b9   : > { %v1766_v20 = vpop.permute.xlu1 %1765  ;;  %v1761_v21 = vpop.permute.xlu0 %1760 }
 0x2ba   : > { %v1823_v22 = vmul.f32 %v1766_v20, %v1599_v14  ;;  %v1822_v23 = vmul.f32 %v1761_v21, %v1598_v15  ;;  %v1994_v20 = vsub.s32 0, %v1993_v19  ;;  %v1990_v21 = vld [vmem:[%s4476_s7] sm:$0x3] }
 0x2bc   : > { %1855 = vst [vmem:[#allocation2 + $0x190] sm:$0xff] %v1823_v22  ;;  %1854 = vst [vmem:[#allocation2 + $0x180] sm:$0xff] %v1822_v23  ;;  %v1950_v29 = vpack.c.bf16 %v1823_v22, %v1822_v23  ;;  %v1998_v22 = vsub.s32 1, %v1993_v19  ;;  %v4303_v23 = vrot.slane %v1990_v21, %v1994_v20 }
 0x2bd   : > { %v1696_v30 = vpop.permute.xlu1 %1695  ;;  %v1691_v31 = vpop.permute.xlu0 %1690 }
 0x2be   : > { %v1809_v32 = vmul.f32 %v1696_v30, %v1585_v24  ;;  %v1808_v33 = vmul.f32 %v1691_v31, %v1584_v25  ;;  %2235 = vmatmul.mubr.bf16.gmra.mrb[16].mxu0 %v1934_v28  ;;  %2315 = vmatmul.mubr.bf16.gmra.mrb[16].mxu1 %v1950_v29  ;;  %v4305_v24 = vrot.slane %v1990_v21, %v1998_v22 }
 0x2bf   : > { %2244 = vmatprep.mubr.bf16.mxu0 %v1937_v26  ;;  %2324 = vmatprep.mubr.bf16.mxu1 %v1953_v27 }
 0x2c0   : > { %1841 = vst [vmem:[#allocation2 + $0xb0] sm:$0xff] %v1809_v32  ;;  %1840 = vst [vmem:[#allocation2 + $0xa0] sm:$0xff] %v1808_v33  ;;  %v1936_v48 = vpack.c.bf16 %v1809_v32, %v1808_v33 }
 0x2c1   : > { %v1776_v40 = vpop.permute.xlu1 %1775  ;;  %v1771_v41 = vpop.permute.xlu0 %1770 }
 0x2c2   : > { %v1825_v42 = vmul.f32 %v1776_v40, %v1601_v34  ;;  %v1824_v43 = vmul.f32 %v1771_v41, %v1600_v35 }
 0x2c4   : > { %1857 = vst [vmem:[#allocation2 + $0x1b0] sm:$0xff] %v1825_v42  ;;  %1856 = vst [vmem:[#allocation2 + $0x1a0] sm:$0xff] %v1824_v43  ;;  %v1952_v49 = vpack.c.bf16 %v1825_v42, %v1824_v43 }
 0x2c5   : > { %v1706_v50 = vpop.permute.xlu1 %1705  ;;  %v1701_v51 = vpop.permute.xlu0 %1700 }
 0x2c6   : > { %v1811_v52 = vmul.f32 %v1706_v50, %v1587_v44  ;;  %v1810_v53 = vmul.f32 %v1701_v51, %v1586_v45  ;;  %2245 = vmatmul.mubr.bf16.gmra.mrb[20].mxu0 %v1936_v48  ;;  %2325 = vmatmul.mubr.bf16.gmra.mrb[20].mxu1 %v1952_v49 }
 0x2c7   : > { %2254 = vmatprep.mubr.bf16.mxu0 %v1939_v46  ;;  %2334 = vmatprep.mubr.bf16.mxu1 %v1955_v47 }
 0x2c8   : > { %1843 = vst [vmem:[#allocation2 + $0xd0] sm:$0xff] %v1811_v52  ;;  %1842 = vst [vmem:[#allocation2 + $0xc0] sm:$0xff] %v1810_v53  ;;  %v1938_v4 = vpack.c.bf16 %v1811_v52, %v1810_v53 }
 0x2c9   : > { %v1786_v60 = vpop.permute.xlu1 %1785  ;;  %v1781_v61 = vpop.permute.xlu0 %1780 }
 0x2ca   : > { %v1827_v62 = vmul.f32 %v1786_v60, %v1603_v54  ;;  %v1826_v63 = vmul.f32 %v1781_v61, %v1602_v55 }
 0x2cc   : > { %1859 = vst [vmem:[#allocation2 + $0x1d0] sm:$0xff] %v1827_v62  ;;  %1858 = vst [vmem:[#allocation2 + $0x1c0] sm:$0xff] %v1826_v63  ;;  %v1954_v5 = vpack.c.bf16 %v1827_v62, %v1826_v63 }
 0x2cd   : > { %v1716_v6 = vpop.permute.xlu1 %1715  ;;  %v1711_v7 = vpop.permute.xlu0 %1710 }
 0x2ce   : > { %v1813_v8 = vmul.f32 %v1716_v6, %v1589_v0  ;;  %v1812_v9 = vmul.f32 %v1711_v7, %v1588_v1  ;;  %2255 = vmatmul.mubr.bf16.gmra.mrb[24].mxu0 %v1938_v4  ;;  %2335 = vmatmul.mubr.bf16.gmra.mrb[24].mxu1 %v1954_v5 }
 0x2cf   : > { %2264 = vmatprep.mubr.bf16.mxu0 %v1941_v2  ;;  %2344 = vmatprep.mubr.bf16.mxu1 %v1957_v3 }
 0x2d0   : > { %1845 = vst [vmem:[#allocation2 + $0xf0] sm:$0xff] %v1813_v8  ;;  %1844 = vst [vmem:[#allocation2 + $0xe0] sm:$0xff] %v1812_v9  ;;  %v1940_v16 = vpack.c.bf16 %v1813_v8, %v1812_v9 }
 0x2d1   : > { %v1796_v12 = vpop.permute.xlu1 %1795  ;;  %v1791_v13 = vpop.permute.xlu0 %1790 }
 0x2d2   : > { %v1829_v14 = vmul.f32 %v1796_v12, %v1605_v10  ;;  %v1828_v15 = vmul.f32 %v1791_v13, %v1604_v11 }
 0x2d4   : > { %1861 = vst [vmem:[#allocation2 + $0x1f0] sm:$0xff] %v1829_v14  ;;  %1860 = vst [vmem:[#allocation2 + $0x1e0] sm:$0xff] %v1828_v15  ;;  %v1956_v17 = vpack.c.bf16 %v1829_v14, %v1828_v15 }
 0x2d6   : > { %2265 = vmatmul.mubr.bf16.gmra.mrb[28].mxu0 %v1940_v16  ;;  %2345 = vmatmul.mubr.bf16.gmra.mrb[28].mxu1 %v1956_v17 }
 0x371   : > { %v2196_v25 = vpop.f32.mrb[0].mxu0  ;;  %v2276_v26 = vpop.f32.mrb[0].mxu1 }
 0x372   : > { %v2197_v27 = vadd.f32 %v2196_v25, %v4303_v23  ;;  %v2277_v28 = vadd.f32 %v2276_v26, %v4303_v23  ;;  %v2198_v29 = vpop.f32.mrb[1].mxu0  ;;  %v2278_v30 = vpop.f32.mrb[1].mxu1 }
 0x373   : > { %v2199_v31 = vadd.f32 %v2198_v29, %v4305_v24  ;;  %v2279_v32 = vadd.f32 %v2278_v30, %v4305_v24  ;;  %v2200_v33 = vpop.f32.mrb[2].mxu0  ;;  %v2280_v34 = vpop.f32.mrb[2].mxu1 }
 0x374   : > { %v2355_v35 = vmax.f32 %v2197_v27, 0.0  ;;  %v2387_v36 = vmax.f32 %v2277_v28, 0.0  ;;  %v2201_v37 = vadd.f32 %v2200_v33, %v4303_v23  ;;  %v2281_v38 = vadd.f32 %v2280_v34, %v4303_v23  ;;  %v2202_v39 = vpop.f32.mrb[3].mxu0  ;;  %v2282_v40 = vpop.f32.mrb[3].mxu1 }
 0x375   : > { %v2356_v41 = vmax.f32 %v2199_v31, 0.0  ;;  %v2388_v42 = vmax.f32 %v2279_v32, 0.0  ;;  %v2203_v43 = vadd.f32 %v2202_v39, %v4305_v24  ;;  %v2283_v44 = vadd.f32 %v2282_v40, %v4305_v24 }
 0x376   : > { %v2357_v45 = vmax.f32 %v2201_v37, 0.0  ;;  %v2389_v46 = vmax.f32 %v2281_v38, 0.0 }
 0x377   : > { %v2964_v47 = vpack.c.bf16 %v2356_v41, %v2355_v35  ;;  %v2980_v48 = vpack.c.bf16 %v2388_v42, %v2387_v36  ;;  %v2358_v49 = vmax.f32 %v2203_v43, 0.0  ;;  %v2390_v50 = vmax.f32 %v2283_v44, 0.0 }
 0x379   : > { %2611 = vst [vmem:[%s4105_s29] sm:$0xff] %v2964_v47  ;;  %2627 = vst [vmem:[%s4105_s29 + $0x80] sm:$0xff] %v2980_v48  ;;  %v2965_v51 = vpack.c.bf16 %v2358_v49, %v2357_v45  ;;  %v2981_v52 = vpack.c.bf16 %v2390_v50, %v2389_v46  ;;  %v2206_v53 = vpop.f32.mrb[4].mxu0  ;;  %v2286_v54 = vpop.f32.mrb[4].mxu1 }
 0x37a   : > { %v2207_v55 = vadd.f32 %v2206_v53, %v4303_v23  ;;  %v2287_v56 = vadd.f32 %v2286_v54, %v4303_v23  ;;  %v2208_v57 = vpop.f32.mrb[5].mxu0  ;;  %v2288_v58 = vpop.f32.mrb[5].mxu1 }
 0x37b   : > { %2612 = vst [vmem:[%s4105_s29 + $0x8] sm:$0xff] %v2965_v51  ;;  %2628 = vst [vmem:[%s4105_s29 + $0x88] sm:$0xff] %v2981_v52  ;;  %v2209_v59 = vadd.f32 %v2208_v57, %v4305_v24  ;;  %v2289_v60 = vadd.f32 %v2288_v58, %v4305_v24  ;;  %v2210_v61 = vpop.f32.mrb[6].mxu0  ;;  %v2290_v62 = vpop.f32.mrb[6].mxu1 }
 0x37c   : > { %v2359_v63 = vmax.f32 %v2207_v55, 0.0  ;;  %v2391_v0 = vmax.f32 %v2287_v56, 0.0  ;;  %v2211_v1 = vadd.f32 %v2210_v61, %v4303_v23  ;;  %v2291_v2 = vadd.f32 %v2290_v62, %v4303_v23  ;;  %v2212_v3 = vpop.f32.mrb[7].mxu0  ;;  %v2292_v4 = vpop.f32.mrb[7].mxu1 }
 0x37d   : > { %v2360_v5 = vmax.f32 %v2209_v59, 0.0  ;;  %v2392_v6 = vmax.f32 %v2289_v60, 0.0  ;;  %v2213_v7 = vadd.f32 %v2212_v3, %v4305_v24  ;;  %v2293_v8 = vadd.f32 %v2292_v4, %v4305_v24 }
 0x37e   : > { %v2361_v9 = vmax.f32 %v2211_v1, 0.0  ;;  %v2393_v10 = vmax.f32 %v2291_v2, 0.0 }
 0x37f   : > { %v2966_v11 = vpack.c.bf16 %v2360_v5, %v2359_v63  ;;  %v2982_v12 = vpack.c.bf16 %v2392_v6, %v2391_v0  ;;  %v2362_v13 = vmax.f32 %v2213_v7, 0.0  ;;  %v2394_v14 = vmax.f32 %v2293_v8, 0.0 }
 0x381   : > { %2613 = vst [vmem:[%s4105_s29 + $0x10] sm:$0xff] %v2966_v11  ;;  %2629 = vst [vmem:[%s4105_s29 + $0x90] sm:$0xff] %v2982_v12  ;;  %v2967_v15 = vpack.c.bf16 %v2362_v13, %v2361_v9  ;;  %v2983_v16 = vpack.c.bf16 %v2394_v14, %v2393_v10  ;;  %v2216_v17 = vpop.f32.mrb[8].mxu0  ;;  %v2296_v18 = vpop.f32.mrb[8].mxu1 }
 0x382   : > { %v2217_v19 = vadd.f32 %v2216_v17, %v4303_v23  ;;  %v2297_v20 = vadd.f32 %v2296_v18, %v4303_v23  ;;  %v2218_v21 = vpop.f32.mrb[9].mxu0  ;;  %v2298_v22 = vpop.f32.mrb[9].mxu1 }
 0x383   : > { %2614 = vst [vmem:[%s4105_s29 + $0x18] sm:$0xff] %v2967_v15  ;;  %2630 = vst [vmem:[%s4105_s29 + $0x98] sm:$0xff] %v2983_v16  ;;  %v2219_v25 = vadd.f32 %v2218_v21, %v4305_v24  ;;  %v2299_v26 = vadd.f32 %v2298_v22, %v4305_v24  ;;  %v2220_v27 = vpop.f32.mrb[10].mxu0  ;;  %v2300_v28 = vpop.f32.mrb[10].mxu1 }
 0x384   : > { %v2363_v29 = vmax.f32 %v2217_v19, 0.0  ;;  %v2395_v30 = vmax.f32 %v2297_v20, 0.0  ;;  %v2221_v31 = vadd.f32 %v2220_v27, %v4303_v23  ;;  %v2301_v32 = vadd.f32 %v2300_v28, %v4303_v23  ;;  %v2222_v33 = vpop.f32.mrb[11].mxu0  ;;  %v2302_v34 = vpop.f32.mrb[11].mxu1 }
 0x385   : > { %v2364_v35 = vmax.f32 %v2219_v25, 0.0  ;;  %v2396_v36 = vmax.f32 %v2299_v26, 0.0  ;;  %v2223_v37 = vadd.f32 %v2222_v33, %v4305_v24  ;;  %v2303_v38 = vadd.f32 %v2302_v34, %v4305_v24 }
 0x386   : > { %v2365_v39 = vmax.f32 %v2221_v31, 0.0  ;;  %v2397_v40 = vmax.f32 %v2301_v32, 0.0 }
 0x387   : > { %v2968_v41 = vpack.c.bf16 %v2364_v35, %v2363_v29  ;;  %v2984_v42 = vpack.c.bf16 %v2396_v36, %v2395_v30  ;;  %v2366_v43 = vmax.f32 %v2223_v37, 0.0  ;;  %v2398_v44 = vmax.f32 %v2303_v38, 0.0 }
 0x389   : > { %2615 = vst [vmem:[%s4105_s29 + $0x20] sm:$0xff] %v2968_v41  ;;  %2631 = vst [vmem:[%s4105_s29 + $0xa0] sm:$0xff] %v2984_v42  ;;  %v2969_v45 = vpack.c.bf16 %v2366_v43, %v2365_v39  ;;  %v2985_v46 = vpack.c.bf16 %v2398_v44, %v2397_v40  ;;  %v2226_v47 = vpop.f32.mrb[12].mxu0  ;;  %v2306_v48 = vpop.f32.mrb[12].mxu1 }
 0x38a   : > { %v2227_v49 = vadd.f32 %v2226_v47, %v4303_v23  ;;  %v2307_v50 = vadd.f32 %v2306_v48, %v4303_v23  ;;  %v2228_v51 = vpop.f32.mrb[13].mxu0  ;;  %v2308_v52 = vpop.f32.mrb[13].mxu1 }
 0x38b   : > { %2616 = vst [vmem:[%s4105_s29 + $0x28] sm:$0xff] %v2969_v45  ;;  %2632 = vst [vmem:[%s4105_s29 + $0xa8] sm:$0xff] %v2985_v46  ;;  %v2229_v53 = vadd.f32 %v2228_v51, %v4305_v24  ;;  %v2309_v54 = vadd.f32 %v2308_v52, %v4305_v24  ;;  %v2230_v55 = vpop.f32.mrb[14].mxu0  ;;  %v2310_v56 = vpop.f32.mrb[14].mxu1 }
 0x38c   : > { %v2367_v57 = vmax.f32 %v2227_v49, 0.0  ;;  %v2399_v58 = vmax.f32 %v2307_v50, 0.0  ;;  %v2231_v59 = vadd.f32 %v2230_v55, %v4303_v23  ;;  %v2311_v60 = vadd.f32 %v2310_v56, %v4303_v23  ;;  %v2232_v61 = vpop.f32.mrb[15].mxu0  ;;  %v2312_v62 = vpop.f32.mrb[15].mxu1 }
 0x38d   : > { %v2368_v63 = vmax.f32 %v2229_v53, 0.0  ;;  %v2400_v0 = vmax.f32 %v2309_v54, 0.0  ;;  %v2233_v1 = vadd.f32 %v2232_v61, %v4305_v24  ;;  %v2313_v2 = vadd.f32 %v2312_v62, %v4305_v24 }
 0x38e   : > { %v2369_v3 = vmax.f32 %v2231_v59, 0.0  ;;  %v2401_v4 = vmax.f32 %v2311_v60, 0.0 }
 0x38f   : > { %v2970_v5 = vpack.c.bf16 %v2368_v63, %v2367_v57  ;;  %v2986_v6 = vpack.c.bf16 %v2400_v0, %v2399_v58  ;;  %v2370_v7 = vmax.f32 %v2233_v1, 0.0  ;;  %v2402_v8 = vmax.f32 %v2313_v2, 0.0 }
 0x391   : > { %2617 = vst [vmem:[%s4105_s29 + $0x30] sm:$0xff] %v2970_v5  ;;  %2633 = vst [vmem:[%s4105_s29 + $0xb0] sm:$0xff] %v2986_v6  ;;  %v2971_v9 = vpack.c.bf16 %v2370_v7, %v2369_v3  ;;  %v2987_v10 = vpack.c.bf16 %v2402_v8, %v2401_v4  ;;  %v2236_v11 = vpop.f32.mrb[16].mxu0  ;;  %v2316_v12 = vpop.f32.mrb[16].mxu1 }
 0x392   : > { %v2237_v13 = vadd.f32 %v2236_v11, %v4303_v23  ;;  %v2317_v14 = vadd.f32 %v2316_v12, %v4303_v23  ;;  %v2238_v15 = vpop.f32.mrb[17].mxu0  ;;  %v2318_v16 = vpop.f32.mrb[17].mxu1 }
 0x393   : > { %2618 = vst [vmem:[%s4105_s29 + $0x38] sm:$0xff] %v2971_v9  ;;  %2634 = vst [vmem:[%s4105_s29 + $0xb8] sm:$0xff] %v2987_v10  ;;  %v2239_v17 = vadd.f32 %v2238_v15, %v4305_v24  ;;  %v2319_v18 = vadd.f32 %v2318_v16, %v4305_v24  ;;  %v2240_v19 = vpop.f32.mrb[18].mxu0  ;;  %v2320_v20 = vpop.f32.mrb[18].mxu1 }
 0x394   : > { %v2371_v21 = vmax.f32 %v2237_v13, 0.0  ;;  %v2403_v22 = vmax.f32 %v2317_v14, 0.0  ;;  %v2241_v25 = vadd.f32 %v2240_v19, %v4303_v23  ;;  %v2321_v26 = vadd.f32 %v2320_v20, %v4303_v23  ;;  %v2242_v27 = vpop.f32.mrb[19].mxu0  ;;  %v2322_v28 = vpop.f32.mrb[19].mxu1 }
 0x395   : > { %v2372_v29 = vmax.f32 %v2239_v17, 0.0  ;;  %v2404_v30 = vmax.f32 %v2319_v18, 0.0  ;;  %v2243_v31 = vadd.f32 %v2242_v27, %v4305_v24  ;;  %v2323_v32 = vadd.f32 %v2322_v28, %v4305_v24 }
 0x396   : > { %v2373_v33 = vmax.f32 %v2241_v25, 0.0  ;;  %v2405_v34 = vmax.f32 %v2321_v26, 0.0 }
 0x397   : > { %v2972_v35 = vpack.c.bf16 %v2372_v29, %v2371_v21  ;;  %v2988_v36 = vpack.c.bf16 %v2404_v30, %v2403_v22  ;;  %v2374_v37 = vmax.f32 %v2243_v31, 0.0  ;;  %v2406_v38 = vmax.f32 %v2323_v32, 0.0 }
 0x399   : > { %2619 = vst [vmem:[%s4105_s29 + $0x40] sm:$0xff] %v2972_v35  ;;  %2635 = vst [vmem:[%s4105_s29 + $0xc0] sm:$0xff] %v2988_v36  ;;  %v2973_v39 = vpack.c.bf16 %v2374_v37, %v2373_v33  ;;  %v2989_v40 = vpack.c.bf16 %v2406_v38, %v2405_v34  ;;  %v2246_v41 = vpop.f32.mrb[20].mxu0  ;;  %v2326_v42 = vpop.f32.mrb[20].mxu1 }
 0x39a   : > { %v2247_v43 = vadd.f32 %v2246_v41, %v4303_v23  ;;  %v2327_v44 = vadd.f32 %v2326_v42, %v4303_v23  ;;  %v2248_v45 = vpop.f32.mrb[21].mxu0  ;;  %v2328_v46 = vpop.f32.mrb[21].mxu1 }
 0x39b   : > { %2620 = vst [vmem:[%s4105_s29 + $0x48] sm:$0xff] %v2973_v39  ;;  %2636 = vst [vmem:[%s4105_s29 + $0xc8] sm:$0xff] %v2989_v40  ;;  %v2249_v47 = vadd.f32 %v2248_v45, %v4305_v24  ;;  %v2329_v48 = vadd.f32 %v2328_v46, %v4305_v24  ;;  %v2250_v49 = vpop.f32.mrb[22].mxu0  ;;  %v2330_v50 = vpop.f32.mrb[22].mxu1 }
 0x39c   : > { %v2375_v51 = vmax.f32 %v2247_v43, 0.0  ;;  %v2407_v52 = vmax.f32 %v2327_v44, 0.0  ;;  %v2251_v53 = vadd.f32 %v2250_v49, %v4303_v23  ;;  %v2331_v54 = vadd.f32 %v2330_v50, %v4303_v23  ;;  %v2252_v55 = vpop.f32.mrb[23].mxu0  ;;  %v2332_v56 = vpop.f32.mrb[23].mxu1 }
 0x39d   : > { %v2376_v57 = vmax.f32 %v2249_v47, 0.0  ;;  %v2408_v58 = vmax.f32 %v2329_v48, 0.0  ;;  %v2253_v59 = vadd.f32 %v2252_v55, %v4305_v24  ;;  %v2333_v60 = vadd.f32 %v2332_v56, %v4305_v24 }
 0x39e   : > { %v2377_v61 = vmax.f32 %v2251_v53, 0.0  ;;  %v2409_v62 = vmax.f32 %v2331_v54, 0.0 }
 0x39f   : > { %v2974_v63 = vpack.c.bf16 %v2376_v57, %v2375_v51  ;;  %v2990_v0 = vpack.c.bf16 %v2408_v58, %v2407_v52  ;;  %v2378_v1 = vmax.f32 %v2253_v59, 0.0  ;;  %v2410_v2 = vmax.f32 %v2333_v60, 0.0 }
 0x3a1   : > { %2621 = vst [vmem:[%s4105_s29 + $0x50] sm:$0xff] %v2974_v63  ;;  %2637 = vst [vmem:[%s4105_s29 + $0xd0] sm:$0xff] %v2990_v0  ;;  %v2975_v3 = vpack.c.bf16 %v2378_v1, %v2377_v61  ;;  %v2991_v4 = vpack.c.bf16 %v2410_v2, %v2409_v62  ;;  %v2256_v5 = vpop.f32.mrb[24].mxu0  ;;  %v2336_v6 = vpop.f32.mrb[24].mxu1 }
 0x3a2   : > { %v2257_v7 = vadd.f32 %v2256_v5, %v4303_v23  ;;  %v2337_v8 = vadd.f32 %v2336_v6, %v4303_v23  ;;  %v2258_v9 = vpop.f32.mrb[25].mxu0  ;;  %v2338_v10 = vpop.f32.mrb[25].mxu1 }
 0x3a3   : > { %2622 = vst [vmem:[%s4105_s29 + $0x58] sm:$0xff] %v2975_v3  ;;  %2638 = vst [vmem:[%s4105_s29 + $0xd8] sm:$0xff] %v2991_v4  ;;  %v2259_v11 = vadd.f32 %v2258_v9, %v4305_v24  ;;  %v2339_v12 = vadd.f32 %v2338_v10, %v4305_v24  ;;  %v2260_v13 = vpop.f32.mrb[26].mxu0  ;;  %v2340_v14 = vpop.f32.mrb[26].mxu1 }
 0x3a4   : > { %v2379_v15 = vmax.f32 %v2257_v7, 0.0  ;;  %v2411_v16 = vmax.f32 %v2337_v8, 0.0  ;;  %v2261_v17 = vadd.f32 %v2260_v13, %v4303_v23  ;;  %v2341_v18 = vadd.f32 %v2340_v14, %v4303_v23  ;;  %v2262_v19 = vpop.f32.mrb[27].mxu0  ;;  %v2342_v20 = vpop.f32.mrb[27].mxu1 }
 0x3a5   : > { %v2380_v21 = vmax.f32 %v2259_v11, 0.0  ;;  %v2412_v22 = vmax.f32 %v2339_v12, 0.0  ;;  %v2263_v25 = vadd.f32 %v2262_v19, %v4305_v24  ;;  %v2343_v26 = vadd.f32 %v2342_v20, %v4305_v24 }
 0x3a6   : > { %v2381_v27 = vmax.f32 %v2261_v17, 0.0  ;;  %v2413_v28 = vmax.f32 %v2341_v18, 0.0 }
 0x3a7   : > { %v2976_v29 = vpack.c.bf16 %v2380_v21, %v2379_v15  ;;  %v2992_v30 = vpack.c.bf16 %v2412_v22, %v2411_v16  ;;  %v2382_v31 = vmax.f32 %v2263_v25, 0.0  ;;  %v2414_v32 = vmax.f32 %v2343_v26, 0.0 }
 0x3a9   : > { %2623 = vst [vmem:[%s4105_s29 + $0x60] sm:$0xff] %v2976_v29  ;;  %2639 = vst [vmem:[%s4105_s29 + $0xe0] sm:$0xff] %v2992_v30  ;;  %v2977_v33 = vpack.c.bf16 %v2382_v31, %v2381_v27  ;;  %v2993_v34 = vpack.c.bf16 %v2414_v32, %v2413_v28  ;;  %v2266_v35 = vpop.f32.mrb[28].mxu0  ;;  %v2346_v36 = vpop.f32.mrb[28].mxu1 }
 0x3aa   : > { %v2267_v37 = vadd.f32 %v2266_v35, %v4303_v23  ;;  %v2347_v38 = vadd.f32 %v2346_v36, %v4303_v23  ;;  %v2268_v39 = vpop.f32.mrb[29].mxu0  ;;  %v2348_v40 = vpop.f32.mrb[29].mxu1 }
 0x3ab   : > { %2624 = vst [vmem:[%s4105_s29 + $0x68] sm:$0xff] %v2977_v33  ;;  %2640 = vst [vmem:[%s4105_s29 + $0xe8] sm:$0xff] %v2993_v34  ;;  %v2269_v41 = vadd.f32 %v2268_v39, %v4305_v24  ;;  %v2349_v42 = vadd.f32 %v2348_v40, %v4305_v24  ;;  %v2270_v43 = vpop.f32.mrb[30].mxu0  ;;  %v2350_v44 = vpop.f32.mrb[30].mxu1 }
 0x3ac   : > { %v2383_v45 = vmax.f32 %v2267_v37, 0.0  ;;  %v2415_v46 = vmax.f32 %v2347_v38, 0.0  ;;  %v2271_v47 = vadd.f32 %v2270_v43, %v4303_v23  ;;  %v2351_v48 = vadd.f32 %v2350_v44, %v4303_v23  ;;  %v2272_v49 = vpop.f32.mrb[31].mxu0  ;;  %v2352_v50 = vpop.f32.mrb[31].mxu1 }
 0x3ad   : > { %v2384_v51 = vmax.f32 %v2269_v41, 0.0  ;;  %v2416_v52 = vmax.f32 %v2349_v42, 0.0  ;;  %v2273_v53 = vadd.f32 %v2272_v49, %v4305_v24  ;;  %v2353_v54 = vadd.f32 %v2352_v50, %v4305_v24 }
 0x3ae   : > { %v2385_v55 = vmax.f32 %v2271_v47, 0.0  ;;  %v2417_v56 = vmax.f32 %v2351_v48, 0.0 }
 0x3af   : > { %v2978_v57 = vpack.c.bf16 %v2384_v51, %v2383_v45  ;;  %v2994_v23 = vpack.c.bf16 %v2416_v52, %v2415_v46  ;;  %v2386_v58 = vmax.f32 %v2273_v53, 0.0  ;;  %v2418_v59 = vmax.f32 %v2353_v54, 0.0 }
 0x3b1   : > { %2625 = vst [vmem:[%s4105_s29 + $0x70] sm:$0xff] %v2978_v57  ;;  %2641 = vst [vmem:[%s4105_s29 + $0xf0] sm:$0xff] %v2994_v23  ;;  %v2979_v24 = vpack.c.bf16 %v2386_v58, %v2385_v55  ;;  %v2995_v60 = vpack.c.bf16 %v2418_v59, %v2417_v56 }
 0x3b3   : > { %2626 = vst [vmem:[%s4105_s29 + $0x78] sm:$0xff] %v2979_v24  ;;  %2642 = vst [vmem:[%s4105_s29 + $0xf8] sm:$0xff] %v2995_v60 }
 0x3b4   : > { %3717 = shalt.err (!%p3714_p6)
}
 0x3b5   : > { %s3718_s21 = scalar_lea.hbm %s4404_s25, 4096  ;;  %s3722_s6 = scalar_lea.hbm %s4511_s12, 8192 }
 0x3b6   : > { %p3719_p8 = scmp.ne.s32.totalorder %s4404_s25, %s3718_s21  ;;  %p3723_p11 = scmp.lt.u32.totalorder %s4404_s25, %s4511_s12 }
 0x3b7   : > { %p3724_p10 = scmp.lt.u32.totalorder %s3722_s6, %s3718_s21  ;;  %p3726_p3 = scmp.lt.u32.totalorder %s3718_s21, %s4404_s25 }
 0x3b8   : > { %p3720_p1 = pnand %p3719_p8, %p4512_p5 }
 0x3b9   : > { %p3725_p13 = por %p3724_p10, %p3723_p11 }
 0x3ba   : > { %p3721_p4 = pneg %p3720_p1 }
 0x3bb   : > { %p3727_p7 = por %p3726_p3, %p3725_p13 }
 0x3bd   : > { %p3728_p9 = pnand %p3727_p7, %p3721_p4 }
 0x3bf   : > { %3731 = shalt.err (!%p3728_p9)
}
 0x3c0   : > { %s3829_s8 = smov 128   ;;  %s3830_s10 = smov 8  }
 0x3c1   : > { %3341 = dma.vmem_to_hbm [thread:$0]  (%p4512_p5), %s4406_s28, 4096, %s4404_s25, %s4414_s19, %s3829_s8, %s3829_s8, %s3830_s10  }
 0x3c2 PF: > { %s4513_s23 = sld [smem:[#allocation18_spill]]  ;;  %s4514_s15 = sld [smem:[#allocation21_spill]] }
 0x3c3   : > { %s4515_s24 = sld [smem:[#allocation20_spill]] }
 0x3c8   : > { %s2673_s0 = sand.u32 1, %s4513_s23   ;;  %p4516_p12 = scmp.ne.s32.totalorder %s4514_s15, 0 }
 0x3c9   : > { %p4517_p0 = scmp.ge.s32.totalorder %s4515_s24, 2  ;;  %s2674_s9 = scalar_lea.sflag [#allocation8], %s2673_s0 }
 0x3cb   : > { %p3354_p2 = pnand %p4517_p0, %p4516_p12 }
 0x3cd   : > { %3779 = dma.done.wait (!%p3354_p2), %s2674_s9, 4096  }
 0x3ce   : > { %3781 = vsyncadd (!%p3354_p2), %s2674_s9, 4294963200  ;;  %s35_s21 = sadd.s32 1, %s4515_s24   ;;  %s4518_s30 = sld [smem:[#allocation19_spill]] }
 0x3cf   : > { %p32_p6 = scmp.ge.s32.totalorder %s35_s21, 4   ;;  %s4519_s15 = sld [smem:[#allocation23_spill]] }
 0x3d0   : > { %s4520_s26 = smov %s4011_s1  ;;  %s4521_s28 = sld [smem:[#allocation22_spill]] }
 0x3d1   : > { %s4522_s1 = smov %s3788_s14  ;;  %s4524_s16 = smov %s3800_s17 }
 0x3d2   : > { %s4525_s17 = smov %s3804_s18  ;;  %s4526_s18 = smov %s4520_s26 }
 0x3d3   : > { %s4527_s19 = smov %s3812_s20  ;;  %34 = sbr.rel (!%p32_p6) target bundleno = 35 (0x23), region = 112 }
 0x3d4   : > { %s4523_s14 = smov %s4518_s30 }
 0x3d6   : > { %s4528_s20 = smov %s4521_s28 }
 0x3da   :  { %2679 = vsyncpa [#allocation7], 1 }
 0x3db   :  { %2681 = vsyncpa [#allocation7 + $0x1], 1 }
 0x3dc   :  { %2682 = vsyncpa [#allocation10], 1 }
 0x3dd   :  { %2683 = vsyncpa [#allocation8], 1 }
 0x3de   :  { %2685 = vsyncpa [#allocation8 + $0x1], 1 }

</bundles_post_ra>
